<compile_context>
chip_gen: v7x
topology: tpu7x:2x2x1
jax: 0.10.0
libtpu: 0.0.40
codegen_flags: <defaults>
</compile_context>

<pallas_src>
import functools
import math

import jax
import jax.numpy as jnp
from jax.experimental import pallas as pl
from jax.experimental.pallas import tpu as pltpu


# ----------------------------------------------------------------------------
# Per-generation sizing (v5e/v6e: 128 MiB VMEM; v7x: 64 MiB)
# ----------------------------------------------------------------------------

try:
    _TPU_VMEM_BYTES = int(pltpu.get_tpu_info().vmem_capacity_bytes)
except Exception:  # older jax / interpret mode — conservative fallback
    _TPU_VMEM_BYTES = None


def _default_block_m():
    if _TPU_VMEM_BYTES is not None and _TPU_VMEM_BYTES >= (100 << 20):
        return 1024   # v5e / v6e (128 MiB VMEM)
    return 256        # v7x (64 MiB VMEM) or unknown


def _vmem_limit_bytes():
    if _TPU_VMEM_BYTES is None:
        return None
    return int(min(_TPU_VMEM_BYTES // 2, 64 << 20))


# ----------------------------------------------------------------------------
# Shared helpers (traced inside kernels)
# ----------------------------------------------------------------------------

def _layer_norm(z, g, b):
    """f32 LayerNorm with single-pass variance E[z^2] - mu^2."""
    mu = jnp.mean(z, axis=-1, keepdims=True)
    var = jnp.mean(z * z, axis=-1, keepdims=True) - mu * mu
    return (z - mu) * jax.lax.rsqrt(var + 1e-5) * g + b


def _mha_heads(q, k, v, nhead):
    """Per-head softmax(QK^T)V; q/k/v are bf16 (L, D); returns bf16 (Lq, D)."""
    d_model = q.shape[-1]
    dh = d_model // nhead
    heads = []
    for h in range(nhead):                           # static unroll over heads
        lo = h * dh
        q_h = q[:, lo:lo + dh]                       # (Lq, Dh)
        k_h = k[:, lo:lo + dh]                       # (Lk, Dh)
        v_h = v[:, lo:lo + dh]                       # (Lk, Dh)
        s = jnp.einsum('qd,kd->qk', q_h, k_h,
                       preferred_element_type=jnp.float32)   # (Lq, Lk) f32
        s = s - jnp.max(s, axis=-1, keepdims=True)
        e = jnp.exp(s)
        p = e * pl.reciprocal(jnp.sum(e, axis=-1, keepdims=True), approx=True)
        heads.append(jnp.dot(p.astype(jnp.bfloat16), v_h,
                             preferred_element_type=jnp.float32))
    # head-contiguous (Lq, D); single out-projection happens in the caller.
    return jnp.concatenate(heads, axis=-1).astype(jnp.bfloat16)


# ----------------------------------------------------------------------------
# Self-attention + residual + LayerNorm  (q == k source; x+pos computed once)
# ----------------------------------------------------------------------------

def _self_mha_ln_kernel(x_ref, pos_ref, wqk_ref, bqk_ref, wv_ref, bv_ref,
                        wo_ref, bo_ref, g_ref, beta_ref, o_ref, *, nhead):
    x = x_ref[0]                                       # (L, D) f32 residual
    qk_in = (x + pos_ref[0]).astype(jnp.bfloat16)      # (L, D) shared q/k input
    x_bf = x.astype(jnp.bfloat16)

    # Fused Q|K projection: one (L,D)@(D,2D) matmul; scale folded into Q half.
    qk = jnp.dot(qk_in, wqk_ref[...],
                 preferred_element_type=jnp.float32) + bqk_ref[...]
    v = jnp.dot(x_bf, wv_ref[...],
                preferred_element_type=jnp.float32) + bv_ref[...]

    d_model = x.shape[-1]
    q = qk[:, :d_model].astype(jnp.bfloat16)
    k = qk[:, d_model:].astype(jnp.bfloat16)
    attn = _mha_heads(q, k, v.astype(jnp.bfloat16), nhead)

    z = x + bo_ref[...] + jnp.dot(attn, wo_ref[...],
                                  preferred_element_type=jnp.float32)
    o_ref[0] = _layer_norm(z, g_ref[...], beta_ref[...])


def self_mha_ln(x, pos, attn_p, ln_g, ln_b, nhead):
    """x, pos: (B, L, D) batch-first."""
    B, L, D = x.shape
    kernel = functools.partial(_self_mha_ln_kernel, nhead=nhead)
    return pl.pallas_call(
        kernel,
        out_shape=jax.ShapeDtypeStruct((B, L, D), jnp.float32),
        grid=(B,),
        in_specs=[
            pl.BlockSpec((1, L, D), lambda b: (b, 0, 0)),
            pl.BlockSpec((1, L, D), lambda b: (b, 0, 0)),
            pl.BlockSpec((D, 2 * D), lambda b: (0, 0)),   # weights resident
            pl.BlockSpec((1, 2 * D), lambda b: (0, 0)),
            pl.BlockSpec((D, D), lambda b: (0, 0)),
            pl.BlockSpec((1, D), lambda b: (0, 0)),
            pl.BlockSpec((D, D), lambda b: (0, 0)),
            pl.BlockSpec((1, D), lambda b: (0, 0)),
            pl.BlockSpec((1, D), lambda b: (0, 0)),
            pl.BlockSpec((1, D), lambda b: (0, 0)),
        ],
        out_specs=pl.BlockSpec((1, L, D), lambda b: (b, 0, 0)),
        compiler_params=pltpu.CompilerParams(
            dimension_semantics=("parallel",),
            vmem_limit_bytes=_vmem_limit_bytes()),
    )(x, pos, attn_p["w_qk"], attn_p["b_qk"], attn_p["w_v"], attn_p["b_v"],
      attn_p["w_out"], attn_p["b_out"], ln_g, ln_b)


# ----------------------------------------------------------------------------
# Cross-attention + residual + LayerNorm  (query-tiled 2-D parallel grid)
# ----------------------------------------------------------------------------

def _cross_mha_ln_kernel(xq_ref, qpos_ref, kv_ref, kpos_ref,
                         wq_ref, bq_ref, wk_ref, bk_ref, wv_ref, bv_ref,
                         wo_ref, bo_ref, g_ref, beta_ref, o_ref, *, nhead):
    x = xq_ref[0]                                      # (tq, D) f32 residual
    q_in = (x + qpos_ref[0]).astype(jnp.bfloat16)
    kv = kv_ref[0]                                     # (Lk, D)
    k_in = (kv + kpos_ref[0]).astype(jnp.bfloat16)
    kv_bf = kv.astype(jnp.bfloat16)

    q = (jnp.dot(q_in, wq_ref[...], preferred_element_type=jnp.float32)
         + bq_ref[...]).astype(jnp.bfloat16)           # scale folded at init
    k = (jnp.dot(k_in, wk_ref[...], preferred_element_type=jnp.float32)
         + bk_ref[...]).astype(jnp.bfloat16)
    v = (jnp.dot(kv_bf, wv_ref[...], preferred_element_type=jnp.float32)
         + bv_ref[...]).astype(jnp.bfloat16)

    attn = _mha_heads(q, k, v, nhead)                  # (tq, D) bf16
    z = x + bo_ref[...] + jnp.dot(attn, wo_ref[...],
                                  preferred_element_type=jnp.float32)
    o_ref[0] = _layer_norm(z, g_ref[...], beta_ref[...])


def cross_mha_ln(x_q, q_pos, kv, k_pos, attn_p, ln_g, ln_b, nhead):
    """x_q/q_pos: (B, Lq, D); kv/k_pos: (B, Lk, D)."""
    B, Lq, D = x_q.shape
    Lk = kv.shape[1]
    tq = Lq if Lq <= 128 else 128
    kernel = functools.partial(_cross_mha_ln_kernel, nhead=nhead)
    return pl.pallas_call(
        kernel,
        out_shape=jax.ShapeDtypeStruct((B, Lq, D), jnp.float32),
        grid=(B, pl.cdiv(Lq, tq)),
        in_specs=[
            pl.BlockSpec((1, tq, D), lambda b, i: (b, i, 0)),
            pl.BlockSpec((1, tq, D), lambda b, i: (b, i, 0)),
            pl.BlockSpec((1, Lk, D), lambda b, i: (b, 0, 0)),
            pl.BlockSpec((1, Lk, D), lambda b, i: (b, 0, 0)),
            pl.BlockSpec((D, D), lambda b, i: (0, 0)),    # weights resident
            pl.BlockSpec((1, D), lambda b, i: (0, 0)),
            pl.BlockSpec((D, D), lambda b, i: (0, 0)),
            pl.BlockSpec((1, D), lambda b, i: (0, 0)),
            pl.BlockSpec((D, D), lambda b, i: (0, 0)),
            pl.BlockSpec((1, D), lambda b, i: (0, 0)),
            pl.BlockSpec((D, D), lambda b, i: (0, 0)),
            pl.BlockSpec((1, D), lambda b, i: (0, 0)),
            pl.BlockSpec((1, D), lambda b, i: (0, 0)),
            pl.BlockSpec((1, D), lambda b, i: (0, 0)),
        ],
        out_specs=pl.BlockSpec((1, tq, D), lambda b, i: (b, i, 0)),
        compiler_params=pltpu.CompilerParams(
            dimension_semantics=("parallel", "parallel"),
            vmem_limit_bytes=_vmem_limit_bytes()),
    )(x_q, q_pos, kv, k_pos,
      attn_p["w_q"], attn_p["b_q"], attn_p["w_k"], attn_p["b_k"],
      attn_p["w_v"], attn_p["b_v"], attn_p["w_out"], attn_p["b_out"],
      ln_g, ln_b)


# ----------------------------------------------------------------------------
# FFN + residual + LayerNorm (row-tiled over M = B*L); optional fused final LN
# ----------------------------------------------------------------------------

def _ffn_body(x, w1, b1, w2, b2, g, b):
    h = jnp.dot(x.astype(jnp.bfloat16), w1,
                preferred_element_type=jnp.float32) + b1
    h = jnp.maximum(h, 0.0)                                          # relu
    y = jnp.dot(h.astype(jnp.bfloat16), w2,
                preferred_element_type=jnp.float32) + b2
    return _layer_norm(x + y, g, b)


def _ffn_ln_kernel(x_ref, w1_ref, b1_ref, w2_ref, b2_ref, g_ref, b_ref, o_ref):
    o_ref[...] = _ffn_body(x_ref[...], w1_ref[...], b1_ref[...],
                           w2_ref[...], b2_ref[...], g_ref[...], b_ref[...])


def _ffn_ln_final_kernel(x_ref, w1_ref, b1_ref, w2_ref, b2_ref, g_ref, b_ref,
                         g2_ref, beta2_ref, o_ref):
    z = _ffn_body(x_ref[...], w1_ref[...], b1_ref[...],
                  w2_ref[...], b2_ref[...], g_ref[...], b_ref[...])
    o_ref[...] = _layer_norm(z, g2_ref[...], beta2_ref[...])   # fused dec norm


def ffn_ln(x2d, w1, b1, w2, b2, ln_g, ln_b, *, block_m,
           final_g=None, final_b=None):
    M, D = x2d.shape
    F = w1.shape[1]
    bm = M if M <= block_m else block_m
    in_specs = [
        pl.BlockSpec((bm, D), lambda i: (i, 0)),
        pl.BlockSpec((D, F), lambda i: (0, 0)),    # weights resident across M
        pl.BlockSpec((1, F), lambda i: (0, 0)),
        pl.BlockSpec((F, D), lambda i: (0, 0)),
        pl.BlockSpec((1, D), lambda i: (0, 0)),
        pl.BlockSpec((1, D), lambda i: (0, 0)),
        pl.BlockSpec((1, D), lambda i: (0, 0)),
    ]
    args = [x2d, w1, b1, w2, b2, ln_g, ln_b]
    if final_g is not None:
        kernel = _ffn_ln_final_kernel
        in_specs += [pl.BlockSpec((1, D), lambda i: (0, 0)),
                     pl.BlockSpec((1, D), lambda i: (0, 0))]
        args += [final_g, final_b]
    else:
        kernel = _ffn_ln_kernel
    return pl.pallas_call(
        kernel,
        out_shape=jax.ShapeDtypeStruct((M, D), jnp.float32),
        grid=(pl.cdiv(M, bm),),
        in_specs=in_specs,
        out_specs=pl.BlockSpec((bm, D), lambda i: (i, 0)),
        compiler_params=pltpu.CompilerParams(
            dimension_semantics=("parallel",),
            vmem_limit_bytes=_vmem_limit_bytes()),
    )(*args)


# ----------------------------------------------------------------------------
# Plain LayerNorm kernel (fallback for a decoder with zero layers)
# ----------------------------------------------------------------------------

def _ln_kernel(x_ref, g_ref, b_ref, o_ref):
    o_ref[...] = _layer_norm(x_ref[...], g_ref[...], b_ref[...])


def layernorm(x2d, ln_g, ln_b, *, block_m):
    M, D = x2d.shape
    bm = M if M <= block_m else block_m
    return pl.pallas_call(
        _ln_kernel,
        out_shape=jax.ShapeDtypeStruct((M, D), jnp.float32),
        grid=(pl.cdiv(M, bm),),
        in_specs=[
            pl.BlockSpec((bm, D), lambda i: (i, 0)),
            pl.BlockSpec((1, D), lambda i: (0, 0)),
            pl.BlockSpec((1, D), lambda i: (0, 0)),
        ],
        out_specs=pl.BlockSpec((bm, D), lambda i: (i, 0)),
        compiler_params=pltpu.CompilerParams(
            dimension_semantics=("parallel",)),
    )(x2d, ln_g, ln_b)


# ----------------------------------------------------------------------------
# Layer / model composition (batch-first internally)
# ----------------------------------------------------------------------------

def encoder_layer_fwd(src, pos, p, nhead, block_m):
    # src, pos: (B, S, D)
    x = self_mha_ln(src, pos, p["self_attn"], p["norm1_g"], p["norm1_b"], nhead)
    B, S, Dm = x.shape
    y = ffn_ln(x.reshape(B * S, Dm), p["lin1_w"], p["lin1_b"],
               p["lin2_w"], p["lin2_b"], p["norm2_g"], p["norm2_b"],
               block_m=block_m)
    return y.reshape(B, S, Dm)


def decoder_layer_fwd(tgt, memory, pos, query_pos, p, nhead, block_m,
                      final_g=None, final_b=None):
    # tgt: (B, T, D), memory: (B, S, D)
    x = self_mha_ln(tgt, query_pos, p["self_attn"],
                    p["norm1_g"], p["norm1_b"], nhead)
    x = cross_mha_ln(x, query_pos, memory, pos, p["cross_attn"],
                     p["norm2_g"], p["norm2_b"], nhead)
    B, T, Dm = x.shape
    y = ffn_ln(x.reshape(B * T, Dm), p["lin1_w"], p["lin1_b"],
               p["lin2_w"], p["lin2_b"], p["norm3_g"], p["norm3_b"],
               block_m=block_m, final_g=final_g, final_b=final_b)
    return y.reshape(B, T, Dm)


def transformer_forward(params, src, tgt, query_embed, pos_embed, nhead,
                        block_m=256):
    # Inputs are sequence-first (L, B, D) like torch; convert once to (B, L, D).
    src_b = jnp.transpose(src, (1, 0, 2))
    tgt_b = jnp.transpose(tgt, (1, 0, 2))
    qe_b = jnp.transpose(query_embed, (1, 0, 2))
    pos_b = jnp.transpose(pos_embed, (1, 0, 2))

    memory = src_b
    for p in params["enc_layers"]:
        memory = encoder_layer_fwd(memory, pos_b, p, nhead, block_m)

    out = tgt_b
    n_dec = len(params["dec_layers"])
    for idx, p in enumerate(params["dec_layers"]):
        is_last = idx == n_dec - 1
        out = decoder_layer_fwd(
            out, memory, pos_b, qe_b, p, nhead, block_m,
            final_g=params["dec_norm_g"] if is_last else None,
            final_b=params["dec_norm_b"] if is_last else None)

    if n_dec == 0:   # decoder norm always applied in the torch module
        B, T, Dm = out.shape
        out = layernorm(out.reshape(B * T, Dm), params["dec_norm_g"],
                        params["dec_norm_b"], block_m=block_m).reshape(B, T, Dm)
    return jnp.transpose(out, (1, 0, 2))   # back to (T, B, D)


# ----------------------------------------------------------------------------
# Parameter init — xavier-uniform matrices, zero biases, ones/zeros LayerNorm.
# Matmul weights stored pre-transposed, packed, scale-folded, and in bf16.
# ----------------------------------------------------------------------------

def xavier_uniform(key, fan_out, fan_in):
    bound = math.sqrt(6.0 / (fan_in + fan_out))
    return jax.random.uniform(key, (fan_out, fan_in), jnp.float32, -bound, bound)


def init_mha(key, d, nhead, self_attn):
    k1, k2 = jax.random.split(key)
    in_w = xavier_uniform(k1, 3 * d, d)                 # torch in_proj_weight (3D, D)
    scale = 1.0 / math.sqrt(d // nhead)                 # folded into Q projection
    w_q = in_w[0:d].T * scale                           # (D, D)
    w_k = in_w[d:2 * d].T                               # (D, D)
    w_v = in_w[2 * d:3 * d].T                           # (D, D)
    w_out = xavier_uniform(k2, d, d).T                  # out_proj.weight.T
    common = dict(
        w_v=w_v.astype(jnp.bfloat16), b_v=jnp.zeros((1, d), jnp.float32),
        w_out=w_out.astype(jnp.bfloat16), b_out=jnp.zeros((1, d), jnp.float32),
    )
    if self_attn:
        return dict(
            w_qk=jnp.concatenate([w_q, w_k], axis=1).astype(jnp.bfloat16),
            b_qk=jnp.zeros((1, 2 * d), jnp.float32), **common)
    return dict(
        w_q=w_q.astype(jnp.bfloat16), b_q=jnp.zeros((1, d), jnp.float32),
        w_k=w_k.astype(jnp.bfloat16), b_k=jnp.zeros((1, d), jnp.float32),
        **common)


def init_layer(key, d, f, nhead, decoder):
    keys = jax.random.split(key, 5)
    p = dict(
        self_attn=init_mha(keys[0], d, nhead, self_attn=True),
        lin1_w=xavier_uniform(keys[1], f, d).T.astype(jnp.bfloat16),   # (D, F)
        lin1_b=jnp.zeros((1, f), jnp.float32),
        lin2_w=xavier_uniform(keys[2], d, f).T.astype(jnp.bfloat16),   # (F, D)
        lin2_b=jnp.zeros((1, d), jnp.float32),
        norm1_g=jnp.ones((1, d), jnp.float32), norm1_b=jnp.zeros((1, d), jnp.float32),
        norm2_g=jnp.ones((1, d), jnp.float32), norm2_b=jnp.zeros((1, d), jnp.float32),
    )
    if decoder:
        p["cross_attn"] = init_mha(keys[3], d, nhead, self_attn=False)
        p["norm3_g"] = jnp.ones((1, d), jnp.float32)
        p["norm3_b"] = jnp.zeros((1, d), jnp.float32)
    return p


def init_transformer(key, d, f, nhead, n_enc, n_dec):
    keys = jax.random.split(key, n_enc + n_dec)
    return dict(
        enc_layers=[init_layer(keys[i], d, f, nhead, decoder=False)
                    for i in range(n_enc)],
        dec_layers=[init_layer(keys[n_enc + i], d, f, nhead, decoder=True)
                    for i in range(n_dec)],
        dec_norm_g=jnp.ones((1, d), jnp.float32),
        dec_norm_b=jnp.zeros((1, d), jnp.float32),
    )


# ----------------------------------------------------------------------------

if __name__ == "__main__":
    # small config consistent with the module (d_model, nhead, ffn, layers)
    D, H, F = 32, 4, 64
    N_ENC, N_DEC = 2, 2
    S, T, B = 8, 8, 2   # src seq len, num queries, batch

    root = jax.random.PRNGKey(0)
    k_par, k_src, k_tgt, k_qe, k_pe = jax.random.split(root, 5)

    params = init_transformer(k_par, D, F, H, N_ENC, N_DEC)

    src = jax.random.normal(k_src, (S, B, D), jnp.float32)
    tgt = jax.random.normal(k_tgt, (T, B, D), jnp.float32)
    query_embed = jax.random.normal(k_qe, (T, B, D), jnp.float32)
    pos_embed = jax.random.normal(k_pe, (S, B, D), jnp.float32)

    fwd = jax.jit(functools.partial(transformer_forward,
                                    nhead=H, block_m=_default_block_m()))
    hs = fwd(params, src, tgt, query_embed, pos_embed)
    jax.block_until_ready(hs)

    assert hs.shape == (T, B, D)
    assert bool(jnp.all(jnp.isfinite(hs)))
    print("KERNEL_OK")
</pallas_src>

<mosaic_0001>
module attributes {stable_mosaic.version = 11 : i64} {
  func.func @_ffn_ln_kernel(%arg0: i32, %arg1: memref<16x32xf32, #tpu.memory_space<vmem>>, %arg2: memref<32x64xbf16, #tpu.memory_space<vmem>>, %arg3: memref<1x64xf32, #tpu.memory_space<vmem>>, %arg4: memref<64x32xbf16, #tpu.memory_space<vmem>>, %arg5: memref<1x32xf32, #tpu.memory_space<vmem>>, %arg6: memref<1x32xf32, #tpu.memory_space<vmem>>, %arg7: memref<1x32xf32, #tpu.memory_space<vmem>>, %arg8: memref<16x32xf32, #tpu.memory_space<vmem>>) attributes {dimension_semantics = [#tpu.dimension_semantics<parallel>], iteration_bounds = array<i64: 1>, scalar_prefetch = 0 : i64, scratch_operands = 0 : i64, tpu.core_type = #tpu.core_type<tc>, window_params = [{transform_indices = @transform_0, window_bounds = array<i64: 16, 32>}, {pipeline_mode = #tpu.pipeline_mode<synchronous>, transform_indices = @transform_1, window_bounds = array<i64: 32, 64>}, {pipeline_mode = #tpu.pipeline_mode<synchronous>, transform_indices = @transform_2, window_bounds = array<i64: 1, 64>}, {pipeline_mode = #tpu.pipeline_mode<synchronous>, transform_indices = @transform_3, window_bounds = array<i64: 64, 32>}, {pipeline_mode = #tpu.pipeline_mode<synchronous>, transform_indices = @transform_4, window_bounds = array<i64: 1, 32>}, {pipeline_mode = #tpu.pipeline_mode<synchronous>, transform_indices = @transform_5, window_bounds = array<i64: 1, 32>}, {pipeline_mode = #tpu.pipeline_mode<synchronous>, transform_indices = @transform_6, window_bounds = array<i64: 1, 32>}, {transform_indices = @transform_7, window_bounds = array<i64: 16, 32>}]} {
    %c0 = arith.constant 0 : index
    %c0_0 = arith.constant 0 : index
    %0 = vector.load %arg1[%c0, %c0_0] : memref<16x32xf32, #tpu.memory_space<vmem>>, vector<16x32xf32>
    %c0_1 = arith.constant 0 : index
    %c0_2 = arith.constant 0 : index
    %1 = vector.load %arg2[%c0_1, %c0_2] : memref<32x64xbf16, #tpu.memory_space<vmem>>, vector<32x64xbf16>
    %c0_3 = arith.constant 0 : index
    %c0_4 = arith.constant 0 : index
    %2 = vector.load %arg3[%c0_3, %c0_4] : memref<1x64xf32, #tpu.memory_space<vmem>>, vector<1x64xf32>
    %c0_5 = arith.constant 0 : index
    %c0_6 = arith.constant 0 : index
    %3 = vector.load %arg4[%c0_5, %c0_6] : memref<64x32xbf16, #tpu.memory_space<vmem>>, vector<64x32xbf16>
    %c0_7 = arith.constant 0 : index
    %c0_8 = arith.constant 0 : index
    %4 = vector.load %arg5[%c0_7, %c0_8] : memref<1x32xf32, #tpu.memory_space<vmem>>, vector<1x32xf32>
    %c0_9 = arith.constant 0 : index
    %c0_10 = arith.constant 0 : index
    %5 = vector.load %arg6[%c0_9, %c0_10] : memref<1x32xf32, #tpu.memory_space<vmem>>, vector<1x32xf32>
    %c0_11 = arith.constant 0 : index
    %c0_12 = arith.constant 0 : index
    %6 = vector.load %arg7[%c0_11, %c0_12] : memref<1x32xf32, #tpu.memory_space<vmem>>, vector<1x32xf32>
    %7 = arith.truncf %0 : vector<16x32xf32> to vector<16x32xbf16>
    %cst = arith.constant dense<0.000000e+00> : vector<16x64xf32>
    %8 = tpu.matmul %7, %1, %cst {dimension_numbers = #tpu.dot_dimension_numbers<[1], [0], [0], [1], [0, 0, 1, 1], [], []>} : vector<16x32xbf16>, vector<32x64xbf16>, vector<16x64xf32> -> vector<16x64xf32>
    %9 = vector.broadcast %2 : vector<1x64xf32> to vector<16x64xf32>
    %10 = arith.addf %8, %9 : vector<16x64xf32>
    %cst_13 = arith.constant 0.000000e+00 : f32
    %11 = vector.broadcast %cst_13 : f32 to vector<16x64xf32>
    %12 = arith.maximumf %10, %11 : vector<16x64xf32>
    %13 = arith.truncf %12 : vector<16x64xf32> to vector<16x64xbf16>
    %cst_14 = arith.constant dense<0.000000e+00> : vector<16x32xf32>
    %14 = tpu.matmul %13, %3, %cst_14 {dimension_numbers = #tpu.dot_dimension_numbers<[1], [0], [0], [1], [0, 0, 1, 1], [], []>} : vector<16x64xbf16>, vector<64x32xbf16>, vector<16x32xf32> -> vector<16x32xf32>
    %15 = vector.broadcast %4 : vector<1x32xf32> to vector<16x32xf32>
    %16 = arith.addf %14, %15 : vector<16x32xf32>
    %17 = arith.addf %0, %16 : vector<16x32xf32>
    %cst_15 = arith.constant dense<0.000000e+00> : vector<16xf32>
    %18 = vector.multi_reduction <add>, %17, %cst_15 [1] : vector<16x32xf32> to vector<16xf32>
    %19 = vector.shape_cast %18 : vector<16xf32> to vector<16x1xf32>
    %cst_16 = arith.constant 3.200000e+01 : f32
    %20 = vector.broadcast %cst_16 : f32 to vector<16x1xf32>
    %21 = arith.divf %19, %20 : vector<16x1xf32>
    %22 = arith.mulf %17, %17 : vector<16x32xf32>
    %cst_17 = arith.constant dense<0.000000e+00> : vector<16xf32>
    %23 = vector.multi_reduction <add>, %22, %cst_17 [1] : vector<16x32xf32> to vector<16xf32>
    %24 = vector.shape_cast %23 : vector<16xf32> to vector<16x1xf32>
    %cst_18 = arith.constant 3.200000e+01 : f32
    %25 = vector.broadcast %cst_18 : f32 to vector<16x1xf32>
    %26 = arith.divf %24, %25 : vector<16x1xf32>
    %27 = arith.mulf %21, %21 : vector<16x1xf32>
    %28 = arith.subf %26, %27 : vector<16x1xf32>
    %29 = vector.broadcast %21 : vector<16x1xf32> to vector<16x32xf32>
    %30 = arith.subf %17, %29 : vector<16x32xf32>
    %cst_19 = arith.constant 9.99999974E-6 : f32
    %31 = vector.broadcast %cst_19 : f32 to vector<16x1xf32>
    %32 = arith.addf %28, %31 : vector<16x1xf32>
    %33 = math.rsqrt %32 : vector<16x1xf32>
    %34 = vector.broadcast %33 : vector<16x1xf32> to vector<16x32xf32>
    %35 = arith.mulf %30, %34 : vector<16x32xf32>
    %36 = vector.broadcast %5 : vector<1x32xf32> to vector<16x32xf32>
    %37 = arith.mulf %35, %36 : vector<16x32xf32>
    %38 = vector.broadcast %6 : vector<1x32xf32> to vector<16x32xf32>
    %39 = arith.addf %37, %38 : vector<16x32xf32>
    %c0_20 = arith.constant 0 : index
    %c0_21 = arith.constant 0 : index
    %40 = vector.load %arg8[%c0_20, %c0_21] : memref<16x32xf32, #tpu.memory_space<vmem>>, vector<16x32xf32>
    tpu.vector_store %arg8[%c0_20, %c0_21], %39 {strides = array<i32>} : memref<16x32xf32, #tpu.memory_space<vmem>>, vector<16x32xf32>,
    return
  }
  func.func @transform_0(%arg0: i32) -> (i32, i32) {
    %c0_i32 = arith.constant 0 : i32
    %c0_i32_0 = arith.constant 0 : i32
    return %arg0, %c0_i32 : i32, i32
  }
  func.func @transform_1(%arg0: i32) -> (i32, i32) {
    %c0_i32 = arith.constant 0 : i32
    %c0_i32_0 = arith.constant 0 : i32
    %c0_i32_1 = arith.constant 0 : i32
    return %c0_i32, %c0_i32_0 : i32, i32
  }
  func.func @transform_2(%arg0: i32) -> (i32, i32) {
    %c0_i32 = arith.constant 0 : i32
    %c0_i32_0 = arith.constant 0 : i32
    %c0_i32_1 = arith.constant 0 : i32
    return %c0_i32, %c0_i32_0 : i32, i32
  }
  func.func @transform_3(%arg0: i32) -> (i32, i32) {
    %c0_i32 = arith.constant 0 : i32
    %c0_i32_0 = arith.constant 0 : i32
    %c0_i32_1 = arith.constant 0 : i32
    return %c0_i32, %c0_i32_0 : i32, i32
  }
  func.func @transform_4(%arg0: i32) -> (i32, i32) {
    %c0_i32 = arith.constant 0 : i32
    %c0_i32_0 = arith.constant 0 : i32
    %c0_i32_1 = arith.constant 0 : i32
    return %c0_i32, %c0_i32_0 : i32, i32
  }
  func.func @transform_5(%arg0: i32) -> (i32, i32) {
    %c0_i32 = arith.constant 0 : i32
    %c0_i32_0 = arith.constant 0 : i32
    %c0_i32_1 = arith.constant 0 : i32
    return %c0_i32, %c0_i32_0 : i32, i32
  }
  func.func @transform_6(%arg0: i32) -> (i32, i32) {
    %c0_i32 = arith.constant 0 : i32
    %c0_i32_0 = arith.constant 0 : i32
    %c0_i32_1 = arith.constant 0 : i32
    return %c0_i32, %c0_i32_0 : i32, i32
  }
  func.func @transform_7(%arg0: i32) -> (i32, i32) {
    %c0_i32 = arith.constant 0 : i32
    %c0_i32_0 = arith.constant 0 : i32
    return %arg0, %c0_i32 : i32, i32
  }
}

module attributes {stable_mosaic.version = 11 : i64} {
  func.func @_self_mha_ln_kernel(%arg0: i32, %arg1: memref<1x8x32xf32, #tpu.memory_space<vmem>>, %arg2: memref<1x8x32xf32, #tpu.memory_space<vmem>>, %arg3: memref<32x64xbf16, #tpu.memory_space<vmem>>, %arg4: memref<1x64xf32, #tpu.memory_space<vmem>>, %arg5: memref<32x32xbf16, #tpu.memory_space<vmem>>, %arg6: memref<1x32xf32, #tpu.memory_space<vmem>>, %arg7: memref<32x32xbf16, #tpu.memory_space<vmem>>, %arg8: memref<1x32xf32, #tpu.memory_space<vmem>>, %arg9: memref<1x32xf32, #tpu.memory_space<vmem>>, %arg10: memref<1x32xf32, #tpu.memory_space<vmem>>, %arg11: memref<1x8x32xf32, #tpu.memory_space<vmem>>) attributes {dimension_semantics = [#tpu.dimension_semantics<parallel>], iteration_bounds = array<i64: 2>, scalar_prefetch = 0 : i64, scratch_operands = 0 : i64, tpu.core_type = #tpu.core_type<tc>, window_params = [{transform_indices = @transform_0, window_bounds = array<i64: 1, 8, 32>}, {transform_indices = @transform_1, window_bounds = array<i64: 1, 8, 32>}, {pipeline_mode = #tpu.pipeline_mode<synchronous>, transform_indices = @transform_2, window_bounds = array<i64: 32, 64>}, {pipeline_mode = #tpu.pipeline_mode<synchronous>, transform_indices = @transform_3, window_bounds = array<i64: 1, 64>}, {pipeline_mode = #tpu.pipeline_mode<synchronous>, transform_indices = @transform_4, window_bounds = array<i64: 32, 32>}, {pipeline_mode = #tpu.pipeline_mode<synchronous>, transform_indices = @transform_5, window_bounds = array<i64: 1, 32>}, {pipeline_mode = #tpu.pipeline_mode<synchronous>, transform_indices = @transform_6, window_bounds = array<i64: 32, 32>}, {pipeline_mode = #tpu.pipeline_mode<synchronous>, transform_indices = @transform_7, window_bounds = array<i64: 1, 32>}, {pipeline_mode = #tpu.pipeline_mode<synchronous>, transform_indices = @transform_8, window_bounds = array<i64: 1, 32>}, {pipeline_mode = #tpu.pipeline_mode<synchronous>, transform_indices = @transform_9, window_bounds = array<i64: 1, 32>}, {transform_indices = @transform_10, window_bounds = array<i64: 1, 8, 32>}]} {
    %c0 = arith.constant 0 : index
    %c0_0 = arith.constant 0 : index
    %c0_1 = arith.constant 0 : index
    %0 = vector.load %arg1[%c0, %c0_0, %c0_1] : memref<1x8x32xf32, #tpu.memory_space<vmem>>, vector<1x8x32xf32>
    %1 = vector.shape_cast %0 : vector<1x8x32xf32> to vector<8x32xf32>
    %c0_2 = arith.constant 0 : index
    %c0_3 = arith.constant 0 : index
    %c0_4 = arith.constant 0 : index
    %2 = vector.load %arg2[%c0_2, %c0_3, %c0_4] : memref<1x8x32xf32, #tpu.memory_space<vmem>>, vector<1x8x32xf32>
    %3 = vector.shape_cast %2 : vector<1x8x32xf32> to vector<8x32xf32>
    %4 = arith.addf %1, %3 : vector<8x32xf32>
    %5 = arith.truncf %4 : vector<8x32xf32> to vector<8x32xbf16>
    %6 = arith.truncf %1 : vector<8x32xf32> to vector<8x32xbf16>
    %c0_5 = arith.constant 0 : index
    %c0_6 = arith.constant 0 : index
    %7 = vector.load %arg3[%c0_5, %c0_6] : memref<32x64xbf16, #tpu.memory_space<vmem>>, vector<32x64xbf16>
    %cst = arith.constant dense<0.000000e+00> : vector<8x64xf32>
    %8 = tpu.matmul %5, %7, %cst {dimension_numbers = #tpu.dot_dimension_numbers<[1], [0], [0], [1], [0, 0, 1, 1], [], []>} : vector<8x32xbf16>, vector<32x64xbf16>, vector<8x64xf32> -> vector<8x64xf32>
    %c0_7 = arith.constant 0 : index
    %c0_8 = arith.constant 0 : index
    %9 = vector.load %arg4[%c0_7, %c0_8] : memref<1x64xf32, #tpu.memory_space<vmem>>, vector<1x64xf32>
    %10 = vector.broadcast %9 : vector<1x64xf32> to vector<8x64xf32>
    %11 = arith.addf %8, %10 : vector<8x64xf32>
    %c0_9 = arith.constant 0 : index
    %c0_10 = arith.constant 0 : index
    %12 = vector.load %arg5[%c0_9, %c0_10] : memref<32x32xbf16, #tpu.memory_space<vmem>>, vector<32x32xbf16>
    %cst_11 = arith.constant dense<0.000000e+00> : vector<8x32xf32>
    %13 = tpu.matmul %6, %12, %cst_11 {dimension_numbers = #tpu.dot_dimension_numbers<[1], [0], [0], [1], [0, 0, 1, 1], [], []>} : vector<8x32xbf16>, vector<32x32xbf16>, vector<8x32xf32> -> vector<8x32xf32>
    %c0_12 = arith.constant 0 : index
    %c0_13 = arith.constant 0 : index
    %14 = vector.load %arg6[%c0_12, %c0_13] : memref<1x32xf32, #tpu.memory_space<vmem>>, vector<1x32xf32>
    %15 = vector.broadcast %14 : vector<1x32xf32> to vector<8x32xf32>
    %16 = arith.addf %13, %15 : vector<8x32xf32>
    %17 = vector.extract_strided_slice %11 {offsets = [0, 0], sizes = [8, 32], strides = [1, 1]} : vector<8x64xf32> to vector<8x32xf32>
    %18 = arith.truncf %17 : vector<8x32xf32> to vector<8x32xbf16>
    %19 = vector.extract_strided_slice %11 {offsets = [0, 32], sizes = [8, 32], strides = [1, 1]} : vector<8x64xf32> to vector<8x32xf32>
    %20 = arith.truncf %19 : vector<8x32xf32> to vector<8x32xbf16>
    %21 = arith.truncf %16 : vector<8x32xf32> to vector<8x32xbf16>
    %22 = vector.extract_strided_slice %18 {offsets = [0, 0], sizes = [8, 8], strides = [1, 1]} : vector<8x32xbf16> to vector<8x8xbf16>
    %23 = vector.extract_strided_slice %20 {offsets = [0, 0], sizes = [8, 8], strides = [1, 1]} : vector<8x32xbf16> to vector<8x8xbf16>
    %24 = vector.extract_strided_slice %21 {offsets = [0, 0], sizes = [8, 8], strides = [1, 1]} : vector<8x32xbf16> to vector<8x8xbf16>
    "tpu.trace_start"() <{level = 10 : i32, message = "qd,kd->qk"}> : () -> ()
    %cst_14 = arith.constant dense<0.000000e+00> : vector<8x8xf32>
    %25 = tpu.matmul %22, %23, %cst_14 {dimension_numbers = #tpu.dot_dimension_numbers<[1], [1], [0], [0], [0, 0, 1, 0], [], []>} : vector<8x8xbf16>, vector<8x8xbf16>, vector<8x8xf32> -> vector<8x8xf32>
    "tpu.trace_stop"() : () -> ()
    %cst_15 = arith.constant dense<0xFF800000> : vector<8xf32>
    %26 = vector.multi_reduction <maximumf>, %25, %cst_15 [1] : vector<8x8xf32> to vector<8xf32>
    %27 = vector.shape_cast %26 : vector<8xf32> to vector<8x1xf32>
    %28 = vector.broadcast %27 : vector<8x1xf32> to vector<8x8xf32>
    %29 = arith.subf %25, %28 : vector<8x8xf32>
    %30 = math.exp %29 : vector<8x8xf32>
    %cst_16 = arith.constant dense<0.000000e+00> : vector<8xf32>
    %31 = vector.multi_reduction <add>, %30, %cst_16 [1] : vector<8x8xf32> to vector<8xf32>
    %32 = vector.shape_cast %31 : vector<8xf32> to vector<8x1xf32>
    %33 = tpu.reciprocal %32 {approx = true} : vector<8x1xf32> -> vector<8x1xf32>
    %34 = vector.broadcast %33 : vector<8x1xf32> to vector<8x8xf32>
    %35 = arith.mulf %30, %34 : vector<8x8xf32>
    %36 = arith.truncf %35 : vector<8x8xf32> to vector<8x8xbf16>
    %cst_17 = arith.constant dense<0.000000e+00> : vector<8x8xf32>
    %37 = tpu.matmul %36, %24, %cst_17 {dimension_numbers = #tpu.dot_dimension_numbers<[1], [0], [0], [1], [0, 0, 1, 1], [], []>} : vector<8x8xbf16>, vector<8x8xbf16>, vector<8x8xf32> -> vector<8x8xf32>
    %38 = vector.extract_strided_slice %18 {offsets = [0, 8], sizes = [8, 8], strides = [1, 1]} : vector<8x32xbf16> to vector<8x8xbf16>
    %39 = vector.extract_strided_slice %20 {offsets = [0, 8], sizes = [8, 8], strides = [1, 1]} : vector<8x32xbf16> to vector<8x8xbf16>
    %40 = vector.extract_strided_slice %21 {offsets = [0, 8], sizes = [8, 8], strides = [1, 1]} : vector<8x32xbf16> to vector<8x8xbf16>
    "tpu.trace_start"() <{level = 10 : i32, message = "qd,kd->qk"}> : () -> ()
    %cst_18 = arith.constant dense<0.000000e+00> : vector<8x8xf32>
    %41 = tpu.matmul %38, %39, %cst_18 {dimension_numbers = #tpu.dot_dimension_numbers<[1], [1], [0], [0], [0, 0, 1, 0], [], []>} : vector<8x8xbf16>, vector<8x8xbf16>, vector<8x8xf32> -> vector<8x8xf32>
    "tpu.trace_stop"() : () -> ()
    %cst_19 = arith.constant dense<0xFF800000> : vector<8xf32>
    %42 = vector.multi_reduction <maximumf>, %41, %cst_19 [1] : vector<8x8xf32> to vector<8xf32>
    %43 = vector.shape_cast %42 : vector<8xf32> to vector<8x1xf32>
    %44 = vector.broadcast %43 : vector<8x1xf32> to vector<8x8xf32>
    %45 = arith.subf %41, %44 : vector<8x8xf32>
    %46 = math.exp %45 : vector<8x8xf32>
    %cst_20 = arith.constant dense<0.000000e+00> : vector<8xf32>
    %47 = vector.multi_reduction <add>, %46, %cst_20 [1] : vector<8x8xf32> to vector<8xf32>
    %48 = vector.shape_cast %47 : vector<8xf32> to vector<8x1xf32>
    %49 = tpu.reciprocal %48 {approx = true} : vector<8x1xf32> -> vector<8x1xf32>
    %50 = vector.broadcast %49 : vector<8x1xf32> to vector<8x8xf32>
    %51 = arith.mulf %46, %50 : vector<8x8xf32>
    %52 = arith.truncf %51 : vector<8x8xf32> to vector<8x8xbf16>
    %cst_21 = arith.constant dense<0.000000e+00> : vector<8x8xf32>
    %53 = tpu.matmul %52, %40, %cst_21 {dimension_numbers = #tpu.dot_dimension_numbers<[1], [0], [0], [1], [0, 0, 1, 1], [], []>} : vector<8x8xbf16>, vector<8x8xbf16>, vector<8x8xf32> -> vector<8x8xf32>
    %54 = vector.extract_strided_slice %18 {offsets = [0, 16], sizes = [8, 8], strides = [1, 1]} : vector<8x32xbf16> to vector<8x8xbf16>
    %55 = vector.extract_strided_slice %20 {offsets = [0, 16], sizes = [8, 8], strides = [1, 1]} : vector<8x32xbf16> to vector<8x8xbf16>
    %56 = vector.extract_strided_slice %21 {offsets = [0, 16], sizes = [8, 8], strides = [1, 1]} : vector<8x32xbf16> to vector<8x8xbf16>
    "tpu.trace_start"() <{level = 10 : i32, message = "qd,kd->qk"}> : () -> ()
    %cst_22 = arith.constant dense<0.000000e+00> : vector<8x8xf32>
    %57 = tpu.matmul %54, %55, %cst_22 {dimension_numbers = #tpu.dot_dimension_numbers<[1], [1], [0], [0], [0, 0, 1, 0], [], []>} : vector<8x8xbf16>, vector<8x8xbf16>, vector<8x8xf32> -> vector<8x8xf32>
    "tpu.trace_stop"() : () -> ()
    %cst_23 = arith.constant dense<0xFF800000> : vector<8xf32>
    %58 = vector.multi_reduction <maximumf>, %57, %cst_23 [1] : vector<8x8xf32> to vector<8xf32>
    %59 = vector.shape_cast %58 : vector<8xf32> to vector<8x1xf32>
    %60 = vector.broadcast %59 : vector<8x1xf32> to vector<8x8xf32>
    %61 = arith.subf %57, %60 : vector<8x8xf32>
    %62 = math.exp %61 : vector<8x8xf32>
    %cst_24 = arith.constant dense<0.000000e+00> : vector<8xf32>
    %63 = vector.multi_reduction <add>, %62, %cst_24 [1] : vector<8x8xf32> to vector<8xf32>
    %64 = vector.shape_cast %63 : vector<8xf32> to vector<8x1xf32>
    %65 = tpu.reciprocal %64 {approx = true} : vector<8x1xf32> -> vector<8x1xf32>
    %66 = vector.broadcast %65 : vector<8x1xf32> to vector<8x8xf32>
    %67 = arith.mulf %62, %66 : vector<8x8xf32>
    %68 = arith.truncf %67 : vector<8x8xf32> to vector<8x8xbf16>
    %cst_25 = arith.constant dense<0.000000e+00> : vector<8x8xf32>
    %69 = tpu.matmul %68, %56, %cst_25 {dimension_numbers = #tpu.dot_dimension_numbers<[1], [0], [0], [1], [0, 0, 1, 1], [], []>} : vector<8x8xbf16>, vector<8x8xbf16>, vector<8x8xf32> -> vector<8x8xf32>
    %70 = vector.extract_strided_slice %18 {offsets = [0, 24], sizes = [8, 8], strides = [1, 1]} : vector<8x32xbf16> to vector<8x8xbf16>
    %71 = vector.extract_strided_slice %20 {offsets = [0, 24], sizes = [8, 8], strides = [1, 1]} : vector<8x32xbf16> to vector<8x8xbf16>
    %72 = vector.extract_strided_slice %21 {offsets = [0, 24], sizes = [8, 8], strides = [1, 1]} : vector<8x32xbf16> to vector<8x8xbf16>
    "tpu.trace_start"() <{level = 10 : i32, message = "qd,kd->qk"}> : () -> ()
    %cst_26 = arith.constant dense<0.000000e+00> : vector<8x8xf32>
    %73 = tpu.matmul %70, %71, %cst_26 {dimension_numbers = #tpu.dot_dimension_numbers<[1], [1], [0], [0], [0, 0, 1, 0], [], []>} : vector<8x8xbf16>, vector<8x8xbf16>, vector<8x8xf32> -> vector<8x8xf32>
    "tpu.trace_stop"() : () -> ()
    %cst_27 = arith.constant dense<0xFF800000> : vector<8xf32>
    %74 = vector.multi_reduction <maximumf>, %73, %cst_27 [1] : vector<8x8xf32> to vector<8xf32>
    %75 = vector.shape_cast %74 : vector<8xf32> to vector<8x1xf32>
    %76 = vector.broadcast %75 : vector<8x1xf32> to vector<8x8xf32>
    %77 = arith.subf %73, %76 : vector<8x8xf32>
    %78 = math.exp %77 : vector<8x8xf32>
    %cst_28 = arith.constant dense<0.000000e+00> : vector<8xf32>
    %79 = vector.multi_reduction <add>, %78, %cst_28 [1] : vector<8x8xf32> to vector<8xf32>
    %80 = vector.shape_cast %79 : vector<8xf32> to vector<8x1xf32>
    %81 = tpu.reciprocal %80 {approx = true} : vector<8x1xf32> -> vector<8x1xf32>
    %82 = vector.broadcast %81 : vector<8x1xf32> to vector<8x8xf32>
    %83 = arith.mulf %78, %82 : vector<8x8xf32>
    %84 = arith.truncf %83 : vector<8x8xf32> to vector<8x8xbf16>
    %cst_29 = arith.constant dense<0.000000e+00> : vector<8x8xf32>
    %85 = tpu.matmul %84, %72, %cst_29 {dimension_numbers = #tpu.dot_dimension_numbers<[1], [0], [0], [1], [0, 0, 1, 1], [], []>} : vector<8x8xbf16>, vector<8x8xbf16>, vector<8x8xf32> -> vector<8x8xf32>
    %86 = tpu.concatenate %37, %53, %69, %85 in 1 : vector<8x8xf32>, vector<8x8xf32>, vector<8x8xf32>, vector<8x8xf32> -> vector<8x32xf32>
    %87 = arith.truncf %86 : vector<8x32xf32> to vector<8x32xbf16>
    %c0_30 = arith.constant 0 : index
    %c0_31 = arith.constant 0 : index
    %88 = vector.load %arg8[%c0_30, %c0_31] : memref<1x32xf32, #tpu.memory_space<vmem>>, vector<1x32xf32>
    %89 = vector.broadcast %88 : vector<1x32xf32> to vector<8x32xf32>
    %90 = arith.addf %1, %89 : vector<8x32xf32>
    %c0_32 = arith.constant 0 : index
    %c0_33 = arith.constant 0 : index
    %91 = vector.load %arg7[%c0_32, %c0_33] : memref<32x32xbf16, #tpu.memory_space<vmem>>, vector<32x32xbf16>
    %cst_34 = arith.constant dense<0.000000e+00> : vector<8x32xf32>
    %92 = tpu.matmul %87, %91, %cst_34 {dimension_numbers = #tpu.dot_dimension_numbers<[1], [0], [0], [1], [0, 0, 1, 1], [], []>} : vector<8x32xbf16>, vector<32x32xbf16>, vector<8x32xf32> -> vector<8x32xf32>
    %93 = arith.addf %90, %92 : vector<8x32xf32>
    %c0_35 = arith.constant 0 : index
    %c0_36 = arith.constant 0 : index
    %94 = vector.load %arg9[%c0_35, %c0_36] : memref<1x32xf32, #tpu.memory_space<vmem>>, vector<1x32xf32>
    %c0_37 = arith.constant 0 : index
    %c0_38 = arith.constant 0 : index
    %95 = vector.load %arg10[%c0_37, %c0_38] : memref<1x32xf32, #tpu.memory_space<vmem>>, vector<1x32xf32>
    %cst_39 = arith.constant dense<0.000000e+00> : vector<8xf32>
    %96 = vector.multi_reduction <add>, %93, %cst_39 [1] : vector<8x32xf32> to vector<8xf32>
    %97 = vector.shape_cast %96 : vector<8xf32> to vector<8x1xf32>
    %cst_40 = arith.constant 3.200000e+01 : f32
    %98 = vector.broadcast %cst_40 : f32 to vector<8x1xf32>
    %99 = arith.divf %97, %98 : vector<8x1xf32>
    %100 = arith.mulf %93, %93 : vector<8x32xf32>
    %cst_41 = arith.constant dense<0.000000e+00> : vector<8xf32>
    %101 = vector.multi_reduction <add>, %100, %cst_41 [1] : vector<8x32xf32> to vector<8xf32>
    %102 = vector.shape_cast %101 : vector<8xf32> to vector<8x1xf32>
    %cst_42 = arith.constant 3.200000e+01 : f32
    %103 = vector.broadcast %cst_42 : f32 to vector<8x1xf32>
    %104 = arith.divf %102, %103 : vector<8x1xf32>
    %105 = arith.mulf %99, %99 : vector<8x1xf32>
    %106 = arith.subf %104, %105 : vector<8x1xf32>
    %107 = vector.broadcast %99 : vector<8x1xf32> to vector<8x32xf32>
    %108 = arith.subf %93, %107 : vector<8x32xf32>
    %cst_43 = arith.constant 9.99999974E-6 : f32
    %109 = vector.broadcast %cst_43 : f32 to vector<8x1xf32>
    %110 = arith.addf %106, %109 : vector<8x1xf32>
    %111 = math.rsqrt %110 : vector<8x1xf32>
    %112 = vector.broadcast %111 : vector<8x1xf32> to vector<8x32xf32>
    %113 = arith.mulf %108, %112 : vector<8x32xf32>
    %114 = vector.broadcast %94 : vector<1x32xf32> to vector<8x32xf32>
    %115 = arith.mulf %113, %114 : vector<8x32xf32>
    %116 = vector.broadcast %95 : vector<1x32xf32> to vector<8x32xf32>
    %117 = arith.addf %115, %116 : vector<8x32xf32>
    %c0_44 = arith.constant 0 : index
    %c0_45 = arith.constant 0 : index
    %c0_46 = arith.constant 0 : index
    %118 = vector.load %arg11[%c0_44, %c0_45, %c0_46] : memref<1x8x32xf32, #tpu.memory_space<vmem>>, vector<1x8x32xf32>
    %119 = vector.shape_cast %118 : vector<1x8x32xf32> to vector<8x32xf32>
    %120 = vector.shape_cast %117 : vector<8x32xf32> to vector<1x8x32xf32>
    tpu.vector_store %arg11[%c0_44, %c0_45, %c0_46], %120 {strides = array<i32>} : memref<1x8x32xf32, #tpu.memory_space<vmem>>, vector<1x8x32xf32>,
    return
  }
  func.func @transform_0(%arg0: i32) -> (i32, i32, i32) {
    %c0_i32 = arith.constant 0 : i32
    %c0_i32_0 = arith.constant 0 : i32
    %c0_i32_1 = arith.constant 0 : i32
    return %arg0, %c0_i32, %c0_i32_0 : i32, i32, i32
  }
  func.func @transform_1(%arg0: i32) -> (i32, i32, i32) {
    %c0_i32 = arith.constant 0 : i32
    %c0_i32_0 = arith.constant 0 : i32
    %c0_i32_1 = arith.constant 0 : i32
    return %arg0, %c0_i32, %c0_i32_0 : i32, i32, i32
  }
  func.func @transform_2(%arg0: i32) -> (i32, i32) {
    %c0_i32 = arith.constant 0 : i32
    %c0_i32_0 = arith.constant 0 : i32
    %c0_i32_1 = arith.constant 0 : i32
    return %c0_i32, %c0_i32_0 : i32, i32
  }
  func.func @transform_3(%arg0: i32) -> (i32, i32) {
    %c0_i32 = arith.constant 0 : i32
    %c0_i32_0 = arith.constant 0 : i32
    %c0_i32_1 = arith.constant 0 : i32
    return %c0_i32, %c0_i32_0 : i32, i32
  }
  func.func @transform_4(%arg0: i32) -> (i32, i32) {
    %c0_i32 = arith.constant 0 : i32
    %c0_i32_0 = arith.constant 0 : i32
    %c0_i32_1 = arith.constant 0 : i32
    return %c0_i32, %c0_i32_0 : i32, i32
  }
  func.func @transform_5(%arg0: i32) -> (i32, i32) {
    %c0_i32 = arith.constant 0 : i32
    %c0_i32_0 = arith.constant 0 : i32
    %c0_i32_1 = arith.constant 0 : i32
    return %c0_i32, %c0_i32_0 : i32, i32
  }
  func.func @transform_6(%arg0: i32) -> (i32, i32) {
    %c0_i32 = arith.constant 0 : i32
    %c0_i32_0 = arith.constant 0 : i32
    %c0_i32_1 = arith.constant 0 : i32
    return %c0_i32, %c0_i32_0 : i32, i32
  }
  func.func @transform_7(%arg0: i32) -> (i32, i32) {
    %c0_i32 = arith.constant 0 : i32
    %c0_i32_0 = arith.constant 0 : i32
    %c0_i32_1 = arith.constant 0 : i32
    return %c0_i32, %c0_i32_0 : i32, i32
  }
  func.func @transform_8(%arg0: i32) -> (i32, i32) {
    %c0_i32 = arith.constant 0 : i32
    %c0_i32_0 = arith.constant 0 : i32
    %c0_i32_1 = arith.constant 0 : i32
    return %c0_i32, %c0_i32_0 : i32, i32
  }
  func.func @transform_9(%arg0: i32) -> (i32, i32) {
    %c0_i32 = arith.constant 0 : i32
    %c0_i32_0 = arith.constant 0 : i32
    %c0_i32_1 = arith.constant 0 : i32
    return %c0_i32, %c0_i32_0 : i32, i32
  }
  func.func @transform_10(%arg0: i32) -> (i32, i32, i32) {
    %c0_i32 = arith.constant 0 : i32
    %c0_i32_0 = arith.constant 0 : i32
    %c0_i32_1 = arith.constant 0 : i32
    return %arg0, %c0_i32, %c0_i32_0 : i32, i32, i32
  }
}

module attributes {stable_mosaic.version = 11 : i64} {
  func.func @_ffn_ln_final_kernel(%arg0: i32, %arg1: memref<16x32xf32, #tpu.memory_space<vmem>>, %arg2: memref<32x64xbf16, #tpu.memory_space<vmem>>, %arg3: memref<1x64xf32, #tpu.memory_space<vmem>>, %arg4: memref<64x32xbf16, #tpu.memory_space<vmem>>, %arg5: memref<1x32xf32, #tpu.memory_space<vmem>>, %arg6: memref<1x32xf32, #tpu.memory_space<vmem>>, %arg7: memref<1x32xf32, #tpu.memory_space<vmem>>, %arg8: memref<1x32xf32, #tpu.memory_space<vmem>>, %arg9: memref<1x32xf32, #tpu.memory_space<vmem>>, %arg10: memref<16x32xf32, #tpu.memory_space<vmem>>) attributes {dimension_semantics = [#tpu.dimension_semantics<parallel>], iteration_bounds = array<i64: 1>, scalar_prefetch = 0 : i64, scratch_operands = 0 : i64, tpu.core_type = #tpu.core_type<tc>, window_params = [{transform_indices = @transform_0, window_bounds = array<i64: 16, 32>}, {pipeline_mode = #tpu.pipeline_mode<synchronous>, transform_indices = @transform_1, window_bounds = array<i64: 32, 64>}, {pipeline_mode = #tpu.pipeline_mode<synchronous>, transform_indices = @transform_2, window_bounds = array<i64: 1, 64>}, {pipeline_mode = #tpu.pipeline_mode<synchronous>, transform_indices = @transform_3, window_bounds = array<i64: 64, 32>}, {pipeline_mode = #tpu.pipeline_mode<synchronous>, transform_indices = @transform_4, window_bounds = array<i64: 1, 32>}, {pipeline_mode = #tpu.pipeline_mode<synchronous>, transform_indices = @transform_5, window_bounds = array<i64: 1, 32>}, {pipeline_mode = #tpu.pipeline_mode<synchronous>, transform_indices = @transform_6, window_bounds = array<i64: 1, 32>}, {pipeline_mode = #tpu.pipeline_mode<synchronous>, transform_indices = @transform_7, window_bounds = array<i64: 1, 32>}, {pipeline_mode = #tpu.pipeline_mode<synchronous>, transform_indices = @transform_8, window_bounds = array<i64: 1, 32>}, {transform_indices = @transform_9, window_bounds = array<i64: 16, 32>}]} {
    %c0 = arith.constant 0 : index
    %c0_0 = arith.constant 0 : index
    %0 = vector.load %arg1[%c0, %c0_0] : memref<16x32xf32, #tpu.memory_space<vmem>>, vector<16x32xf32>
    %c0_1 = arith.constant 0 : index
    %c0_2 = arith.constant 0 : index
    %1 = vector.load %arg2[%c0_1, %c0_2] : memref<32x64xbf16, #tpu.memory_space<vmem>>, vector<32x64xbf16>
    %c0_3 = arith.constant 0 : index
    %c0_4 = arith.constant 0 : index
    %2 = vector.load %arg3[%c0_3, %c0_4] : memref<1x64xf32, #tpu.memory_space<vmem>>, vector<1x64xf32>
    %c0_5 = arith.constant 0 : index
    %c0_6 = arith.constant 0 : index
    %3 = vector.load %arg4[%c0_5, %c0_6] : memref<64x32xbf16, #tpu.memory_space<vmem>>, vector<64x32xbf16>
    %c0_7 = arith.constant 0 : index
    %c0_8 = arith.constant 0 : index
    %4 = vector.load %arg5[%c0_7, %c0_8] : memref<1x32xf32, #tpu.memory_space<vmem>>, vector<1x32xf32>
    %c0_9 = arith.constant 0 : index
    %c0_10 = arith.constant 0 : index
    %5 = vector.load %arg6[%c0_9, %c0_10] : memref<1x32xf32, #tpu.memory_space<vmem>>, vector<1x32xf32>
    %c0_11 = arith.constant 0 : index
    %c0_12 = arith.constant 0 : index
    %6 = vector.load %arg7[%c0_11, %c0_12] : memref<1x32xf32, #tpu.memory_space<vmem>>, vector<1x32xf32>
    %7 = arith.truncf %0 : vector<16x32xf32> to vector<16x32xbf16>
    %cst = arith.constant dense<0.000000e+00> : vector<16x64xf32>
    %8 = tpu.matmul %7, %1, %cst {dimension_numbers = #tpu.dot_dimension_numbers<[1], [0], [0], [1], [0, 0, 1, 1], [], []>} : vector<16x32xbf16>, vector<32x64xbf16>, vector<16x64xf32> -> vector<16x64xf32>
    %9 = vector.broadcast %2 : vector<1x64xf32> to vector<16x64xf32>
    %10 = arith.addf %8, %9 : vector<16x64xf32>
    %cst_13 = arith.constant 0.000000e+00 : f32
    %11 = vector.broadcast %cst_13 : f32 to vector<16x64xf32>
    %12 = arith.maximumf %10, %11 : vector<16x64xf32>
    %13 = arith.truncf %12 : vector<16x64xf32> to vector<16x64xbf16>
    %cst_14 = arith.constant dense<0.000000e+00> : vector<16x32xf32>
    %14 = tpu.matmul %13, %3, %cst_14 {dimension_numbers = #tpu.dot_dimension_numbers<[1], [0], [0], [1], [0, 0, 1, 1], [], []>} : vector<16x64xbf16>, vector<64x32xbf16>, vector<16x32xf32> -> vector<16x32xf32>
    %15 = vector.broadcast %4 : vector<1x32xf32> to vector<16x32xf32>
    %16 = arith.addf %14, %15 : vector<16x32xf32>
    %17 = arith.addf %0, %16 : vector<16x32xf32>
    %cst_15 = arith.constant dense<0.000000e+00> : vector<16xf32>
    %18 = vector.multi_reduction <add>, %17, %cst_15 [1] : vector<16x32xf32> to vector<16xf32>
    %19 = vector.shape_cast %18 : vector<16xf32> to vector<16x1xf32>
    %cst_16 = arith.constant 3.200000e+01 : f32
    %20 = vector.broadcast %cst_16 : f32 to vector<16x1xf32>
    %21 = arith.divf %19, %20 : vector<16x1xf32>
    %22 = arith.mulf %17, %17 : vector<16x32xf32>
    %cst_17 = arith.constant dense<0.000000e+00> : vector<16xf32>
    %23 = vector.multi_reduction <add>, %22, %cst_17 [1] : vector<16x32xf32> to vector<16xf32>
    %24 = vector.shape_cast %23 : vector<16xf32> to vector<16x1xf32>
    %cst_18 = arith.constant 3.200000e+01 : f32
    %25 = vector.broadcast %cst_18 : f32 to vector<16x1xf32>
    %26 = arith.divf %24, %25 : vector<16x1xf32>
    %27 = arith.mulf %21, %21 : vector<16x1xf32>
    %28 = arith.subf %26, %27 : vector<16x1xf32>
    %29 = vector.broadcast %21 : vector<16x1xf32> to vector<16x32xf32>
    %30 = arith.subf %17, %29 : vector<16x32xf32>
    %cst_19 = arith.constant 9.99999974E-6 : f32
    %31 = vector.broadcast %cst_19 : f32 to vector<16x1xf32>
    %32 = arith.addf %28, %31 : vector<16x1xf32>
    %33 = math.rsqrt %32 : vector<16x1xf32>
    %34 = vector.broadcast %33 : vector<16x1xf32> to vector<16x32xf32>
    %35 = arith.mulf %30, %34 : vector<16x32xf32>
    %36 = vector.broadcast %5 : vector<1x32xf32> to vector<16x32xf32>
    %37 = arith.mulf %35, %36 : vector<16x32xf32>
    %38 = vector.broadcast %6 : vector<1x32xf32> to vector<16x32xf32>
    %39 = arith.addf %37, %38 : vector<16x32xf32>
    %c0_20 = arith.constant 0 : index
    %c0_21 = arith.constant 0 : index
    %40 = vector.load %arg8[%c0_20, %c0_21] : memref<1x32xf32, #tpu.memory_space<vmem>>, vector<1x32xf32>
    %c0_22 = arith.constant 0 : index
    %c0_23 = arith.constant 0 : index
    %41 = vector.load %arg9[%c0_22, %c0_23] : memref<1x32xf32, #tpu.memory_space<vmem>>, vector<1x32xf32>
    %cst_24 = arith.constant dense<0.000000e+00> : vector<16xf32>
    %42 = vector.multi_reduction <add>, %39, %cst_24 [1] : vector<16x32xf32> to vector<16xf32>
    %43 = vector.shape_cast %42 : vector<16xf32> to vector<16x1xf32>
    %cst_25 = arith.constant 3.200000e+01 : f32
    %44 = vector.broadcast %cst_25 : f32 to vector<16x1xf32>
    %45 = arith.divf %43, %44 : vector<16x1xf32>
    %46 = arith.mulf %39, %39 : vector<16x32xf32>
    %cst_26 = arith.constant dense<0.000000e+00> : vector<16xf32>
    %47 = vector.multi_reduction <add>, %46, %cst_26 [1] : vector<16x32xf32> to vector<16xf32>
    %48 = vector.shape_cast %47 : vector<16xf32> to vector<16x1xf32>
    %cst_27 = arith.constant 3.200000e+01 : f32
    %49 = vector.broadcast %cst_27 : f32 to vector<16x1xf32>
    %50 = arith.divf %48, %49 : vector<16x1xf32>
    %51 = arith.mulf %45, %45 : vector<16x1xf32>
    %52 = arith.subf %50, %51 : vector<16x1xf32>
    %53 = vector.broadcast %45 : vector<16x1xf32> to vector<16x32xf32>
    %54 = arith.subf %39, %53 : vector<16x32xf32>
    %cst_28 = arith.constant 9.99999974E-6 : f32
    %55 = vector.broadcast %cst_28 : f32 to vector<16x1xf32>
    %56 = arith.addf %52, %55 : vector<16x1xf32>
    %57 = math.rsqrt %56 : vector<16x1xf32>
    %58 = vector.broadcast %57 : vector<16x1xf32> to vector<16x32xf32>
    %59 = arith.mulf %54, %58 : vector<16x32xf32>
    %60 = vector.broadcast %40 : vector<1x32xf32> to vector<16x32xf32>
    %61 = arith.mulf %59, %60 : vector<16x32xf32>
    %62 = vector.broadcast %41 : vector<1x32xf32> to vector<16x32xf32>
    %63 = arith.addf %61, %62 : vector<16x32xf32>
    %c0_29 = arith.constant 0 : index
    %c0_30 = arith.constant 0 : index
    %64 = vector.load %arg10[%c0_29, %c0_30] : memref<16x32xf32, #tpu.memory_space<vmem>>, vector<16x32xf32>
    tpu.vector_store %arg10[%c0_29, %c0_30], %63 {strides = array<i32>} : memref<16x32xf32, #tpu.memory_space<vmem>>, vector<16x32xf32>,
    return
  }
  func.func @transform_0(%arg0: i32) -> (i32, i32) {
    %c0_i32 = arith.constant 0 : i32
    %c0_i32_0 = arith.constant 0 : i32
    return %arg0, %c0_i32 : i32, i32
  }
  func.func @transform_1(%arg0: i32) -> (i32, i32) {
    %c0_i32 = arith.constant 0 : i32
    %c0_i32_0 = arith.constant 0 : i32
    %c0_i32_1 = arith.constant 0 : i32
    return %c0_i32, %c0_i32_0 : i32, i32
  }
  func.func @transform_2(%arg0: i32) -> (i32, i32) {
    %c0_i32 = arith.constant 0 : i32
    %c0_i32_0 = arith.constant 0 : i32
    %c0_i32_1 = arith.constant 0 : i32
    return %c0_i32, %c0_i32_0 : i32, i32
  }
  func.func @transform_3(%arg0: i32) -> (i32, i32) {
    %c0_i32 = arith.constant 0 : i32
    %c0_i32_0 = arith.constant 0 : i32
    %c0_i32_1 = arith.constant 0 : i32
    return %c0_i32, %c0_i32_0 : i32, i32
  }
  func.func @transform_4(%arg0: i32) -> (i32, i32) {
    %c0_i32 = arith.constant 0 : i32
    %c0_i32_0 = arith.constant 0 : i32
    %c0_i32_1 = arith.constant 0 : i32
    return %c0_i32, %c0_i32_0 : i32, i32
  }
  func.func @transform_5(%arg0: i32) -> (i32, i32) {
    %c0_i32 = arith.constant 0 : i32
    %c0_i32_0 = arith.constant 0 : i32
    %c0_i32_1 = arith.constant 0 : i32
    return %c0_i32, %c0_i32_0 : i32, i32
  }
  func.func @transform_6(%arg0: i32) -> (i32, i32) {
    %c0_i32 = arith.constant 0 : i32
    %c0_i32_0 = arith.constant 0 : i32
    %c0_i32_1 = arith.constant 0 : i32
    return %c0_i32, %c0_i32_0 : i32, i32
  }
  func.func @transform_7(%arg0: i32) -> (i32, i32) {
    %c0_i32 = arith.constant 0 : i32
    %c0_i32_0 = arith.constant 0 : i32
    %c0_i32_1 = arith.constant 0 : i32
    return %c0_i32, %c0_i32_0 : i32, i32
  }
  func.func @transform_8(%arg0: i32) -> (i32, i32) {
    %c0_i32 = arith.constant 0 : i32
    %c0_i32_0 = arith.constant 0 : i32
    %c0_i32_1 = arith.constant 0 : i32
    return %c0_i32, %c0_i32_0 : i32, i32
  }
  func.func @transform_9(%arg0: i32) -> (i32, i32) {
    %c0_i32 = arith.constant 0 : i32
    %c0_i32_0 = arith.constant 0 : i32
    return %arg0, %c0_i32 : i32, i32
  }
}

module attributes {stable_mosaic.version = 11 : i64} {
  func.func @_cross_mha_ln_kernel(%arg0: i32, %arg1: i32, %arg2: memref<1x8x32xf32, #tpu.memory_space<vmem>>, %arg3: memref<1x8x32xf32, #tpu.memory_space<vmem>>, %arg4: memref<1x8x32xf32, #tpu.memory_space<vmem>>, %arg5: memref<1x8x32xf32, #tpu.memory_space<vmem>>, %arg6: memref<32x32xbf16, #tpu.memory_space<vmem>>, %arg7: memref<1x32xf32, #tpu.memory_space<vmem>>, %arg8: memref<32x32xbf16, #tpu.memory_space<vmem>>, %arg9: memref<1x32xf32, #tpu.memory_space<vmem>>, %arg10: memref<32x32xbf16, #tpu.memory_space<vmem>>, %arg11: memref<1x32xf32, #tpu.memory_space<vmem>>, %arg12: memref<32x32xbf16, #tpu.memory_space<vmem>>, %arg13: memref<1x32xf32, #tpu.memory_space<vmem>>, %arg14: memref<1x32xf32, #tpu.memory_space<vmem>>, %arg15: memref<1x32xf32, #tpu.memory_space<vmem>>, %arg16: memref<1x8x32xf32, #tpu.memory_space<vmem>>) attributes {dimension_semantics = [#tpu.dimension_semantics<parallel>, #tpu.dimension_semantics<parallel>], iteration_bounds = array<i64: 2, 1>, scalar_prefetch = 0 : i64, scratch_operands = 0 : i64, tpu.core_type = #tpu.core_type<tc>, window_params = [{transform_indices = @transform_0, window_bounds = array<i64: 1, 8, 32>}, {transform_indices = @transform_1, window_bounds = array<i64: 1, 8, 32>}, {transform_indices = @transform_2, window_bounds = array<i64: 1, 8, 32>}, {transform_indices = @transform_3, window_bounds = array<i64: 1, 8, 32>}, {pipeline_mode = #tpu.pipeline_mode<synchronous>, transform_indices = @transform_4, window_bounds = array<i64: 32, 32>}, {pipeline_mode = #tpu.pipeline_mode<synchronous>, transform_indices = @transform_5, window_bounds = array<i64: 1, 32>}, {pipeline_mode = #tpu.pipeline_mode<synchronous>, transform_indices = @transform_6, window_bounds = array<i64: 32, 32>}, {pipeline_mode = #tpu.pipeline_mode<synchronous>, transform_indices = @transform_7, window_bounds = array<i64: 1, 32>}, {pipeline_mode = #tpu.pipeline_mode<synchronous>, transform_indices = @transform_8, window_bounds = array<i64: 32, 32>}, {pipeline_mode = #tpu.pipeline_mode<synchronous>, transform_indices = @transform_9, window_bounds = array<i64: 1, 32>}, {pipeline_mode = #tpu.pipeline_mode<synchronous>, transform_indices = @transform_10, window_bounds = array<i64: 32, 32>}, {pipeline_mode = #tpu.pipeline_mode<synchronous>, transform_indices = @transform_11, window_bounds = array<i64: 1, 32>}, {pipeline_mode = #tpu.pipeline_mode<synchronous>, transform_indices = @transform_12, window_bounds = array<i64: 1, 32>}, {pipeline_mode = #tpu.pipeline_mode<synchronous>, transform_indices = @transform_13, window_bounds = array<i64: 1, 32>}, {transform_indices = @transform_14, window_bounds = array<i64: 1, 8, 32>}]} {
    %c0 = arith.constant 0 : index
    %c0_0 = arith.constant 0 : index
    %c0_1 = arith.constant 0 : index
    %0 = vector.load %arg2[%c0, %c0_0, %c0_1] : memref<1x8x32xf32, #tpu.memory_space<vmem>>, vector<1x8x32xf32>
    %1 = vector.shape_cast %0 : vector<1x8x32xf32> to vector<8x32xf32>
    %c0_2 = arith.constant 0 : index
    %c0_3 = arith.constant 0 : index
    %c0_4 = arith.constant 0 : index
    %2 = vector.load %arg3[%c0_2, %c0_3, %c0_4] : memref<1x8x32xf32, #tpu.memory_space<vmem>>, vector<1x8x32xf32>
    %3 = vector.shape_cast %2 : vector<1x8x32xf32> to vector<8x32xf32>
    %4 = arith.addf %1, %3 : vector<8x32xf32>
    %5 = arith.truncf %4 : vector<8x32xf32> to vector<8x32xbf16>
    %c0_5 = arith.constant 0 : index
    %c0_6 = arith.constant 0 : index
    %c0_7 = arith.constant 0 : index
    %6 = vector.load %arg4[%c0_5, %c0_6, %c0_7] : memref<1x8x32xf32, #tpu.memory_space<vmem>>, vector<1x8x32xf32>
    %7 = vector.shape_cast %6 : vector<1x8x32xf32> to vector<8x32xf32>
    %c0_8 = arith.constant 0 : index
    %c0_9 = arith.constant 0 : index
    %c0_10 = arith.constant 0 : index
    %8 = vector.load %arg5[%c0_8, %c0_9, %c0_10] : memref<1x8x32xf32, #tpu.memory_space<vmem>>, vector<1x8x32xf32>
    %9 = vector.shape_cast %8 : vector<1x8x32xf32> to vector<8x32xf32>
    %10 = arith.addf %7, %9 : vector<8x32xf32>
    %11 = arith.truncf %10 : vector<8x32xf32> to vector<8x32xbf16>
    %12 = arith.truncf %7 : vector<8x32xf32> to vector<8x32xbf16>
    %c0_11 = arith.constant 0 : index
    %c0_12 = arith.constant 0 : index
    %13 = vector.load %arg6[%c0_11, %c0_12] : memref<32x32xbf16, #tpu.memory_space<vmem>>, vector<32x32xbf16>
    %cst = arith.constant dense<0.000000e+00> : vector<8x32xf32>
    %14 = tpu.matmul %5, %13, %cst {dimension_numbers = #tpu.dot_dimension_numbers<[1], [0], [0], [1], [0, 0, 1, 1], [], []>} : vector<8x32xbf16>, vector<32x32xbf16>, vector<8x32xf32> -> vector<8x32xf32>
    %c0_13 = arith.constant 0 : index
    %c0_14 = arith.constant 0 : index
    %15 = vector.load %arg7[%c0_13, %c0_14] : memref<1x32xf32, #tpu.memory_space<vmem>>, vector<1x32xf32>
    %16 = vector.broadcast %15 : vector<1x32xf32> to vector<8x32xf32>
    %17 = arith.addf %14, %16 : vector<8x32xf32>
    %18 = arith.truncf %17 : vector<8x32xf32> to vector<8x32xbf16>
    %c0_15 = arith.constant 0 : index
    %c0_16 = arith.constant 0 : index
    %19 = vector.load %arg8[%c0_15, %c0_16] : memref<32x32xbf16, #tpu.memory_space<vmem>>, vector<32x32xbf16>
    %cst_17 = arith.constant dense<0.000000e+00> : vector<8x32xf32>
    %20 = tpu.matmul %11, %19, %cst_17 {dimension_numbers = #tpu.dot_dimension_numbers<[1], [0], [0], [1], [0, 0, 1, 1], [], []>} : vector<8x32xbf16>, vector<32x32xbf16>, vector<8x32xf32> -> vector<8x32xf32>
    %c0_18 = arith.constant 0 : index
    %c0_19 = arith.constant 0 : index
    %21 = vector.load %arg9[%c0_18, %c0_19] : memref<1x32xf32, #tpu.memory_space<vmem>>, vector<1x32xf32>
    %22 = vector.broadcast %21 : vector<1x32xf32> to vector<8x32xf32>
    %23 = arith.addf %20, %22 : vector<8x32xf32>
    %24 = arith.truncf %23 : vector<8x32xf32> to vector<8x32xbf16>
    %c0_20 = arith.constant 0 : index
    %c0_21 = arith.constant 0 : index
    %25 = vector.load %arg10[%c0_20, %c0_21] : memref<32x32xbf16, #tpu.memory_space<vmem>>, vector<32x32xbf16>
    %cst_22 = arith.constant dense<0.000000e+00> : vector<8x32xf32>
    %26 = tpu.matmul %12, %25, %cst_22 {dimension_numbers = #tpu.dot_dimension_numbers<[1], [0], [0], [1], [0, 0, 1, 1], [], []>} : vector<8x32xbf16>, vector<32x32xbf16>, vector<8x32xf32> -> vector<8x32xf32>
    %c0_23 = arith.constant 0 : index
    %c0_24 = arith.constant 0 : index
    %27 = vector.load %arg11[%c0_23, %c0_24] : memref<1x32xf32, #tpu.memory_space<vmem>>, vector<1x32xf32>
    %28 = vector.broadcast %27 : vector<1x32xf32> to vector<8x32xf32>
    %29 = arith.addf %26, %28 : vector<8x32xf32>
    %30 = arith.truncf %29 : vector<8x32xf32> to vector<8x32xbf16>
    %31 = vector.extract_strided_slice %18 {offsets = [0, 0], sizes = [8, 8], strides = [1, 1]} : vector<8x32xbf16> to vector<8x8xbf16>
    %32 = vector.extract_strided_slice %24 {offsets = [0, 0], sizes = [8, 8], strides = [1, 1]} : vector<8x32xbf16> to vector<8x8xbf16>
    %33 = vector.extract_strided_slice %30 {offsets = [0, 0], sizes = [8, 8], strides = [1, 1]} : vector<8x32xbf16> to vector<8x8xbf16>
    "tpu.trace_start"() <{level = 10 : i32, message = "qd,kd->qk"}> : () -> ()
    %cst_25 = arith.constant dense<0.000000e+00> : vector<8x8xf32>
    %34 = tpu.matmul %31, %32, %cst_25 {dimension_numbers = #tpu.dot_dimension_numbers<[1], [1], [0], [0], [0, 0, 1, 0], [], []>} : vector<8x8xbf16>, vector<8x8xbf16>, vector<8x8xf32> -> vector<8x8xf32>
    "tpu.trace_stop"() : () -> ()
    %cst_26 = arith.constant dense<0xFF800000> : vector<8xf32>
    %35 = vector.multi_reduction <maximumf>, %34, %cst_26 [1] : vector<8x8xf32> to vector<8xf32>
    %36 = vector.shape_cast %35 : vector<8xf32> to vector<8x1xf32>
    %37 = vector.broadcast %36 : vector<8x1xf32> to vector<8x8xf32>
    %38 = arith.subf %34, %37 : vector<8x8xf32>
    %39 = math.exp %38 : vector<8x8xf32>
    %cst_27 = arith.constant dense<0.000000e+00> : vector<8xf32>
    %40 = vector.multi_reduction <add>, %39, %cst_27 [1] : vector<8x8xf32> to vector<8xf32>
    %41 = vector.shape_cast %40 : vector<8xf32> to vector<8x1xf32>
    %42 = tpu.reciprocal %41 {approx = true} : vector<8x1xf32> -> vector<8x1xf32>
    %43 = vector.broadcast %42 : vector<8x1xf32> to vector<8x8xf32>
    %44 = arith.mulf %39, %43 : vector<8x8xf32>
    %45 = arith.truncf %44 : vector<8x8xf32> to vector<8x8xbf16>
    %cst_28 = arith.constant dense<0.000000e+00> : vector<8x8xf32>
    %46 = tpu.matmul %45, %33, %cst_28 {dimension_numbers = #tpu.dot_dimension_numbers<[1], [0], [0], [1], [0, 0, 1, 1], [], []>} : vector<8x8xbf16>, vector<8x8xbf16>, vector<8x8xf32> -> vector<8x8xf32>
    %47 = vector.extract_strided_slice %18 {offsets = [0, 8], sizes = [8, 8], strides = [1, 1]} : vector<8x32xbf16> to vector<8x8xbf16>
    %48 = vector.extract_strided_slice %24 {offsets = [0, 8], sizes = [8, 8], strides = [1, 1]} : vector<8x32xbf16> to vector<8x8xbf16>
    %49 = vector.extract_strided_slice %30 {offsets = [0, 8], sizes = [8, 8], strides = [1, 1]} : vector<8x32xbf16> to vector<8x8xbf16>
    "tpu.trace_start"() <{level = 10 : i32, message = "qd,kd->qk"}> : () -> ()
    %cst_29 = arith.constant dense<0.000000e+00> : vector<8x8xf32>
    %50 = tpu.matmul %47, %48, %cst_29 {dimension_numbers = #tpu.dot_dimension_numbers<[1], [1], [0], [0], [0, 0, 1, 0], [], []>} : vector<8x8xbf16>, vector<8x8xbf16>, vector<8x8xf32> -> vector<8x8xf32>
    "tpu.trace_stop"() : () -> ()
    %cst_30 = arith.constant dense<0xFF800000> : vector<8xf32>
    %51 = vector.multi_reduction <maximumf>, %50, %cst_30 [1] : vector<8x8xf32> to vector<8xf32>
    %52 = vector.shape_cast %51 : vector<8xf32> to vector<8x1xf32>
    %53 = vector.broadcast %52 : vector<8x1xf32> to vector<8x8xf32>
    %54 = arith.subf %50, %53 : vector<8x8xf32>
    %55 = math.exp %54 : vector<8x8xf32>
    %cst_31 = arith.constant dense<0.000000e+00> : vector<8xf32>
    %56 = vector.multi_reduction <add>, %55, %cst_31 [1] : vector<8x8xf32> to vector<8xf32>
    %57 = vector.shape_cast %56 : vector<8xf32> to vector<8x1xf32>
    %58 = tpu.reciprocal %57 {approx = true} : vector<8x1xf32> -> vector<8x1xf32>
    %59 = vector.broadcast %58 : vector<8x1xf32> to vector<8x8xf32>
    %60 = arith.mulf %55, %59 : vector<8x8xf32>
    %61 = arith.truncf %60 : vector<8x8xf32> to vector<8x8xbf16>
    %cst_32 = arith.constant dense<0.000000e+00> : vector<8x8xf32>
    %62 = tpu.matmul %61, %49, %cst_32 {dimension_numbers = #tpu.dot_dimension_numbers<[1], [0], [0], [1], [0, 0, 1, 1], [], []>} : vector<8x8xbf16>, vector<8x8xbf16>, vector<8x8xf32> -> vector<8x8xf32>
    %63 = vector.extract_strided_slice %18 {offsets = [0, 16], sizes = [8, 8], strides = [1, 1]} : vector<8x32xbf16> to vector<8x8xbf16>
    %64 = vector.extract_strided_slice %24 {offsets = [0, 16], sizes = [8, 8], strides = [1, 1]} : vector<8x32xbf16> to vector<8x8xbf16>
    %65 = vector.extract_strided_slice %30 {offsets = [0, 16], sizes = [8, 8], strides = [1, 1]} : vector<8x32xbf16> to vector<8x8xbf16>
    "tpu.trace_start"() <{level = 10 : i32, message = "qd,kd->qk"}> : () -> ()
    %cst_33 = arith.constant dense<0.000000e+00> : vector<8x8xf32>
    %66 = tpu.matmul %63, %64, %cst_33 {dimension_numbers = #tpu.dot_dimension_numbers<[1], [1], [0], [0], [0, 0, 1, 0], [], []>} : vector<8x8xbf16>, vector<8x8xbf16>, vector<8x8xf32> -> vector<8x8xf32>
    "tpu.trace_stop"() : () -> ()
    %cst_34 = arith.constant dense<0xFF800000> : vector<8xf32>
    %67 = vector.multi_reduction <maximumf>, %66, %cst_34 [1] : vector<8x8xf32> to vector<8xf32>
    %68 = vector.shape_cast %67 : vector<8xf32> to vector<8x1xf32>
    %69 = vector.broadcast %68 : vector<8x1xf32> to vector<8x8xf32>
    %70 = arith.subf %66, %69 : vector<8x8xf32>
    %71 = math.exp %70 : vector<8x8xf32>
    %cst_35 = arith.constant dense<0.000000e+00> : vector<8xf32>
    %72 = vector.multi_reduction <add>, %71, %cst_35 [1] : vector<8x8xf32> to vector<8xf32>
    %73 = vector.shape_cast %72 : vector<8xf32> to vector<8x1xf32>
    %74 = tpu.reciprocal %73 {approx = true} : vector<8x1xf32> -> vector<8x1xf32>
    %75 = vector.broadcast %74 : vector<8x1xf32> to vector<8x8xf32>
    %76 = arith.mulf %71, %75 : vector<8x8xf32>
    %77 = arith.truncf %76 : vector<8x8xf32> to vector<8x8xbf16>
    %cst_36 = arith.constant dense<0.000000e+00> : vector<8x8xf32>
    %78 = tpu.matmul %77, %65, %cst_36 {dimension_numbers = #tpu.dot_dimension_numbers<[1], [0], [0], [1], [0, 0, 1, 1], [], []>} : vector<8x8xbf16>, vector<8x8xbf16>, vector<8x8xf32> -> vector<8x8xf32>
    %79 = vector.extract_strided_slice %18 {offsets = [0, 24], sizes = [8, 8], strides = [1, 1]} : vector<8x32xbf16> to vector<8x8xbf16>
    %80 = vector.extract_strided_slice %24 {offsets = [0, 24], sizes = [8, 8], strides = [1, 1]} : vector<8x32xbf16> to vector<8x8xbf16>
    %81 = vector.extract_strided_slice %30 {offsets = [0, 24], sizes = [8, 8], strides = [1, 1]} : vector<8x32xbf16> to vector<8x8xbf16>
    "tpu.trace_start"() <{level = 10 : i32, message = "qd,kd->qk"}> : () -> ()
    %cst_37 = arith.constant dense<0.000000e+00> : vector<8x8xf32>
    %82 = tpu.matmul %79, %80, %cst_37 {dimension_numbers = #tpu.dot_dimension_numbers<[1], [1], [0], [0], [0, 0, 1, 0], [], []>} : vector<8x8xbf16>, vector<8x8xbf16>, vector<8x8xf32> -> vector<8x8xf32>
    "tpu.trace_stop"() : () -> ()
    %cst_38 = arith.constant dense<0xFF800000> : vector<8xf32>
    %83 = vector.multi_reduction <maximumf>, %82, %cst_38 [1] : vector<8x8xf32> to vector<8xf32>
    %84 = vector.shape_cast %83 : vector<8xf32> to vector<8x1xf32>
    %85 = vector.broadcast %84 : vector<8x1xf32> to vector<8x8xf32>
    %86 = arith.subf %82, %85 : vector<8x8xf32>
    %87 = math.exp %86 : vector<8x8xf32>
    %cst_39 = arith.constant dense<0.000000e+00> : vector<8xf32>
    %88 = vector.multi_reduction <add>, %87, %cst_39 [1] : vector<8x8xf32> to vector<8xf32>
    %89 = vector.shape_cast %88 : vector<8xf32> to vector<8x1xf32>
    %90 = tpu.reciprocal %89 {approx = true} : vector<8x1xf32> -> vector<8x1xf32>
    %91 = vector.broadcast %90 : vector<8x1xf32> to vector<8x8xf32>
    %92 = arith.mulf %87, %91 : vector<8x8xf32>
    %93 = arith.truncf %92 : vector<8x8xf32> to vector<8x8xbf16>
    %cst_40 = arith.constant dense<0.000000e+00> : vector<8x8xf32>
    %94 = tpu.matmul %93, %81, %cst_40 {dimension_numbers = #tpu.dot_dimension_numbers<[1], [0], [0], [1], [0, 0, 1, 1], [], []>} : vector<8x8xbf16>, vector<8x8xbf16>, vector<8x8xf32> -> vector<8x8xf32>
    %95 = tpu.concatenate %46, %62, %78, %94 in 1 : vector<8x8xf32>, vector<8x8xf32>, vector<8x8xf32>, vector<8x8xf32> -> vector<8x32xf32>
    %96 = arith.truncf %95 : vector<8x32xf32> to vector<8x32xbf16>
    %c0_41 = arith.constant 0 : index
    %c0_42 = arith.constant 0 : index
    %97 = vector.load %arg13[%c0_41, %c0_42] : memref<1x32xf32, #tpu.memory_space<vmem>>, vector<1x32xf32>
    %98 = vector.broadcast %97 : vector<1x32xf32> to vector<8x32xf32>
    %99 = arith.addf %1, %98 : vector<8x32xf32>
    %c0_43 = arith.constant 0 : index
    %c0_44 = arith.constant 0 : index
    %100 = vector.load %arg12[%c0_43, %c0_44] : memref<32x32xbf16, #tpu.memory_space<vmem>>, vector<32x32xbf16>
    %cst_45 = arith.constant dense<0.000000e+00> : vector<8x32xf32>
    %101 = tpu.matmul %96, %100, %cst_45 {dimension_numbers = #tpu.dot_dimension_numbers<[1], [0], [0], [1], [0, 0, 1, 1], [], []>} : vector<8x32xbf16>, vector<32x32xbf16>, vector<8x32xf32> -> vector<8x32xf32>
    %102 = arith.addf %99, %101 : vector<8x32xf32>
    %c0_46 = arith.constant 0 : index
    %c0_47 = arith.constant 0 : index
    %103 = vector.load %arg14[%c0_46, %c0_47] : memref<1x32xf32, #tpu.memory_space<vmem>>, vector<1x32xf32>
    %c0_48 = arith.constant 0 : index
    %c0_49 = arith.constant 0 : index
    %104 = vector.load %arg15[%c0_48, %c0_49] : memref<1x32xf32, #tpu.memory_space<vmem>>, vector<1x32xf32>
    %cst_50 = arith.constant dense<0.000000e+00> : vector<8xf32>
    %105 = vector.multi_reduction <add>, %102, %cst_50 [1] : vector<8x32xf32> to vector<8xf32>
    %106 = vector.shape_cast %105 : vector<8xf32> to vector<8x1xf32>
    %cst_51 = arith.constant 3.200000e+01 : f32
    %107 = vector.broadcast %cst_51 : f32 to vector<8x1xf32>
    %108 = arith.divf %106, %107 : vector<8x1xf32>
    %109 = arith.mulf %102, %102 : vector<8x32xf32>
    %cst_52 = arith.constant dense<0.000000e+00> : vector<8xf32>
    %110 = vector.multi_reduction <add>, %109, %cst_52 [1] : vector<8x32xf32> to vector<8xf32>
    %111 = vector.shape_cast %110 : vector<8xf32> to vector<8x1xf32>
    %cst_53 = arith.constant 3.200000e+01 : f32
    %112 = vector.broadcast %cst_53 : f32 to vector<8x1xf32>
    %113 = arith.divf %111, %112 : vector<8x1xf32>
    %114 = arith.mulf %108, %108 : vector<8x1xf32>
    %115 = arith.subf %113, %114 : vector<8x1xf32>
    %116 = vector.broadcast %108 : vector<8x1xf32> to vector<8x32xf32>
    %117 = arith.subf %102, %116 : vector<8x32xf32>
    %cst_54 = arith.constant 9.99999974E-6 : f32
    %118 = vector.broadcast %cst_54 : f32 to vector<8x1xf32>
    %119 = arith.addf %115, %118 : vector<8x1xf32>
    %120 = math.rsqrt %119 : vector<8x1xf32>
    %121 = vector.broadcast %120 : vector<8x1xf32> to vector<8x32xf32>
    %122 = arith.mulf %117, %121 : vector<8x32xf32>
    %123 = vector.broadcast %103 : vector<1x32xf32> to vector<8x32xf32>
    %124 = arith.mulf %122, %123 : vector<8x32xf32>
    %125 = vector.broadcast %104 : vector<1x32xf32> to vector<8x32xf32>
    %126 = arith.addf %124, %125 : vector<8x32xf32>
    %c0_55 = arith.constant 0 : index
    %c0_56 = arith.constant 0 : index
    %c0_57 = arith.constant 0 : index
    %127 = vector.load %arg16[%c0_55, %c0_56, %c0_57] : memref<1x8x32xf32, #tpu.memory_space<vmem>>, vector<1x8x32xf32>
    %128 = vector.shape_cast %127 : vector<1x8x32xf32> to vector<8x32xf32>
    %129 = vector.shape_cast %126 : vector<8x32xf32> to vector<1x8x32xf32>
    tpu.vector_store %arg16[%c0_55, %c0_56, %c0_57], %129 {strides = array<i32>} : memref<1x8x32xf32, #tpu.memory_space<vmem>>, vector<1x8x32xf32>,
    return
  }
  func.func @transform_0(%arg0: i32, %arg1: i32) -> (i32, i32, i32) {
    %c0_i32 = arith.constant 0 : i32
    %c0_i32_0 = arith.constant 0 : i32
    return %arg0, %arg1, %c0_i32 : i32, i32, i32
  }
  func.func @transform_1(%arg0: i32, %arg1: i32) -> (i32, i32, i32) {
    %c0_i32 = arith.constant 0 : i32
    %c0_i32_0 = arith.constant 0 : i32
    return %arg0, %arg1, %c0_i32 : i32, i32, i32
  }
  func.func @transform_2(%arg0: i32, %arg1: i32) -> (i32, i32, i32) {
    %c0_i32 = arith.constant 0 : i32
    %c0_i32_0 = arith.constant 0 : i32
    %c0_i32_1 = arith.constant 0 : i32
    return %arg0, %c0_i32, %c0_i32_0 : i32, i32, i32
  }
  func.func @transform_3(%arg0: i32, %arg1: i32) -> (i32, i32, i32) {
    %c0_i32 = arith.constant 0 : i32
    %c0_i32_0 = arith.constant 0 : i32
    %c0_i32_1 = arith.constant 0 : i32
    return %arg0, %c0_i32, %c0_i32_0 : i32, i32, i32
  }
  func.func @transform_4(%arg0: i32, %arg1: i32) -> (i32, i32) {
    %c0_i32 = arith.constant 0 : i32
    %c0_i32_0 = arith.constant 0 : i32
    %c0_i32_1 = arith.constant 0 : i32
    return %c0_i32, %c0_i32_0 : i32, i32
  }
  func.func @transform_5(%arg0: i32, %arg1: i32) -> (i32, i32) {
    %c0_i32 = arith.constant 0 : i32
    %c0_i32_0 = arith.constant 0 : i32
    %c0_i32_1 = arith.constant 0 : i32
    return %c0_i32, %c0_i32_0 : i32, i32
  }
  func.func @transform_6(%arg0: i32, %arg1: i32) -> (i32, i32) {
    %c0_i32 = arith.constant 0 : i32
    %c0_i32_0 = arith.constant 0 : i32
    %c0_i32_1 = arith.constant 0 : i32
    return %c0_i32, %c0_i32_0 : i32, i32
  }
  func.func @transform_7(%arg0: i32, %arg1: i32) -> (i32, i32) {
    %c0_i32 = arith.constant 0 : i32
    %c0_i32_0 = arith.constant 0 : i32
    %c0_i32_1 = arith.constant 0 : i32
    return %c0_i32, %c0_i32_0 : i32, i32
  }
  func.func @transform_8(%arg0: i32, %arg1: i32) -> (i32, i32) {
    %c0_i32 = arith.constant 0 : i32
    %c0_i32_0 = arith.constant 0 : i32
    %c0_i32_1 = arith.constant 0 : i32
    return %c0_i32, %c0_i32_0 : i32, i32
  }
  func.func @transform_9(%arg0: i32, %arg1: i32) -> (i32, i32) {
    %c0_i32 = arith.constant 0 : i32
    %c0_i32_0 = arith.constant 0 : i32
    %c0_i32_1 = arith.constant 0 : i32
    return %c0_i32, %c0_i32_0 : i32, i32
  }
  func.func @transform_10(%arg0: i32, %arg1: i32) -> (i32, i32) {
    %c0_i32 = arith.constant 0 : i32
    %c0_i32_0 = arith.constant 0 : i32
    %c0_i32_1 = arith.constant 0 : i32
    return %c0_i32, %c0_i32_0 : i32, i32
  }
  func.func @transform_11(%arg0: i32, %arg1: i32) -> (i32, i32) {
    %c0_i32 = arith.constant 0 : i32
    %c0_i32_0 = arith.constant 0 : i32
    %c0_i32_1 = arith.constant 0 : i32
    return %c0_i32, %c0_i32_0 : i32, i32
  }
  func.func @transform_12(%arg0: i32, %arg1: i32) -> (i32, i32) {
    %c0_i32 = arith.constant 0 : i32
    %c0_i32_0 = arith.constant 0 : i32
    %c0_i32_1 = arith.constant 0 : i32
    return %c0_i32, %c0_i32_0 : i32, i32
  }
  func.func @transform_13(%arg0: i32, %arg1: i32) -> (i32, i32) {
    %c0_i32 = arith.constant 0 : i32
    %c0_i32_0 = arith.constant 0 : i32
    %c0_i32_1 = arith.constant 0 : i32
    return %c0_i32, %c0_i32_0 : i32, i32
  }
  func.func @transform_14(%arg0: i32, %arg1: i32) -> (i32, i32, i32) {
    %c0_i32 = arith.constant 0 : i32
    %c0_i32_0 = arith.constant 0 : i32
    return %arg0, %arg1, %c0_i32 : i32, i32, i32
  }
}

</mosaic_0001>

<bundles_post_ra>
// kernel: transformer_forward.11
= control target key start
LH: loop header
LB: loop body
LE: loop exit
PB: predicated region body
PF: predicated region fallthrough
CT: control target
= control target key end

     0   :  { %v294_v0 = vmov 0.0   ;;  %vm295_vm0 = vmmov 0   ;;  %vm64_vm1 = vcmask 261120   ;;  %vm142_vm2 = vcmask 523264   ;;  %s385_s1 = inlined_call_operand.vmem [shape: bf16[32,64], index: 1, kind: input, shape index: {}]   ;;  %s386_s0 = inlined_call_operand.vmem [shape: f32[16,32], index: 0, kind: input, shape index: {}]   ;;  %s387_s3 = inlined_call_operand.vmem [shape: bf16[64,32], index: 3, kind: input, shape index: {}]   ;;  %s388_s2 = inlined_call_operand.vmem [shape: f32[1,64], index: 2, kind: input, shape index: {}]   ;;  %s389_s4 = inlined_call_operand.vmem [shape: f32[1,32], index: 4, kind: input, shape index: {}]   ;;  %s390_s5 = inlined_call_operand.vmem [shape: f32[1,32], index: 5, kind: input, shape index: {}]   ;;  %s391_s6 = inlined_call_operand.vmem [shape: f32[1,32], index: 6, kind: input, shape index: {}]   ;;  %s392_s7 = inlined_call_operand.vmem [shape: f32[16,32], index: 7, kind: output, shape index: {}]  }
   0x1   :  { %262 = vmatprep.subr.bf16.mxu0 %v294_v0  ;;  %v284_v1 = vld [vmem:[%s385_s1] sm:$0xff]   ;;  %266 = vmatprep.mubr.msk.bf16.mxu0 %vm295_vm0, %v294_v0  ;;  %v285_v2 = vld [vmem:[%s385_s1 + $0x8] sm:$0xff]   ;;  %v288_v8 = vld [vmem:[%s387_s3 + $0x10] sm:$0xff]  }
   0x2   :  { %270 = vmatprep.subr.bf16.mxu1 %v294_v0  ;;  %278 = vmatprep.mubr.msk.bf16.mxu1 %vm295_vm0, %v294_v0  ;;  %v27_v3 = vld [vmem:[%s386_s0] sm:$0xff]  ;;  %v28_v4 = vld [vmem:[%s386_s0 + $0x8] sm:$0xff]  ;;  %v289_v9 = vld [vmem:[%s387_s3 + $0x18] sm:$0xff]  }
   0x3   :  { %263 = vmatpush3.bf16.msra.mxu0 %v284_v1  ;;  %v286_v5 = vld [vmem:[%s387_s3] sm:$0xff]   ;;  %v287_v6 = vld [vmem:[%s387_s3 + $0x8] sm:$0xff]   ;;  %v45_v7 = vpack.c.bf16 %v28_v4, %v27_v3 }
   0x4   :  { %264 = vmatprep.subr.bf16.mxu0 %v294_v0  ;;  %271 = vmatpush3.bf16.msra.mxu1 %v286_v5  ;;  %v242_v10 = vld [vmem:[%s388_s2] ss:$0 sm:$0xff] }
   0x5   :  { %272 = vmatprep.subr.bf16.mxu1 %v294_v0  ;;  %v246_v20 = vld [vmem:[%s389_s4] ss:$0 sm:$0xff] }
   0x6   :  { %v252_v51 = vld [vmem:[%s390_s5] ss:$0 sm:$0xff] }
   0x7   :  { %265 = vmatpush3.bf16.msra.mxu0 %v285_v2  ;;  %v253_v53 = vld [vmem:[%s391_s6] ss:$0 sm:$0xff] }
   0x8   :  { %273 = vmatpush3.bf16.msra.mxu1 %v287_v6 }
   0x9   :  { %274 = vmatprep.subr.bf16.mxu1 %v294_v0 }
   0xa   :  { %267 = vmatmul.mubr.msk.bf16.vlgmr.msra.gmra.mrb[0].mxu0 %vm64_vm1, %v45_v7 }
   0xc   :  { %275 = vmatpush3.bf16.msra.mxu1 %v288_v8 }
   0xd   :  { %276 = vmatprep.subr.bf16.mxu1 %v294_v0 }
  0x10   :  { %277 = vmatpush3.bf16.msra.mxu1 %v289_v9 }
  0xdd   :  { %v102_v11 = vpop.f32.mrb[0].mxu0 }
  0xde   :  { %v103_v12 = vadd.f32 %v242_v10, %v102_v11  ;;  %v268_v13 = vpop.f32.mrb[1].mxu0 }
  0xdf   :  { %v105_v14 = vpop.f32.mrb[2].mxu0 }
  0xe0   :  { %v106_v15 = vadd.f32 %v242_v10, %v105_v14  ;;  %v269_v16 = vpop.f32.mrb[3].mxu0  ;;  %v109_v17 = vmax.f32 %v103_v12, 0.0 }
  0xe2   :  { %v110_v18 = vmax.f32 %v106_v15, 0.0 }
  0xe4   :  { %v111_v19 = vpack.c.bf16 %v110_v18, %v109_v17 }
  0xe6   :  { %279 = vmatmul.mubr.msk.bf16.vlgmr.msra.gmra.mrb[0].mxu1 %vm142_vm2, %v111_v19 }
 0x1b9   :  { %v180_v21 = vpop.f32.mrb[0].mxu1 }
 0x1ba   :  { %v181_v22 = vadd.f32 %v246_v20, %v180_v21  ;;  %v280_v23 = vpop.f32.mrb[1].mxu1 }
 0x1bb   :  { %v183_v24 = vpop.f32.mrb[2].mxu1 }
 0x1bc   :  { %v187_v25 = vadd.f32 %v181_v22, %v27_v3  ;;  %v184_v26 = vadd.f32 %v246_v20, %v183_v24  ;;  %v281_v27 = vpop.f32.mrb[3].mxu1 }
 0x1be   :  { %v188_v28 = vadd.f32 %v184_v26, %v28_v4  ;;  %v189_v29 = vsel %vm64_vm1, %v187_v25, 0.0  ;;  %v198_v30 = vmul.f32 %v187_v25, %v187_v25 }
 0x1bf   :  { %190 = vadd.xlane.f32.xlu0 %v189_v29 }
 0x1c0   :  { %v200_v31 = vsel %vm64_vm1, %v198_v30, 0.0  ;;  %v199_v32 = vmul.f32 %v188_v28, %v188_v28  ;;  %v192_v33 = vsel %vm64_vm1, %v188_v28, 0.0 }
 0x1c1   :  { %201 = vadd.xlane.f32.xlu1 %v200_v31 }
 0x1c2   :  { %v203_v34 = vsel %vm64_vm1, %v199_v32, 0.0 }
 0x1c3   :  { %193 = vadd.xlane.f32.xlu0 %v192_v33 }
 0x1c5   :  { %204 = vadd.xlane.f32.xlu1 %v203_v34 }
 0x24c   :  { %v191_v35 = vpop.xlane.xlu0 %190 }
 0x24d   :  { %v196_v36 = vmul.f32 0.03125, %v191_v35 }
 0x24e   :  { %v202_v37 = vpop.xlane.xlu1 %201 }
 0x24f   :  { %v208_v38 = vmul.f32 %v196_v36, %v196_v36  ;;  %v206_v39 = vmul.f32 0.03125, %v202_v37  ;;  %v212_v49 = vsub.f32 %v187_v25, %v196_v36 }
 0x250   :  { %v194_v40 = vpop.xlane.xlu0 %193 }
 0x251   :  { %v210_v41 = vsub.f32 %v206_v39, %v208_v38  ;;  %v197_v42 = vmul.f32 0.03125, %v194_v40 }
 0x252   :  { %v205_v43 = vpop.xlane.xlu1 %204 }
 0x253   :  { %v214_v44 = vadd.f32 1e-05, %v210_v41  ;;  %v209_v45 = vmul.f32 %v197_v42, %v197_v42  ;;  %v207_v46 = vmul.f32 0.03125, %v205_v43  ;;  %v213_v55 = vsub.f32 %v188_v28, %v197_v42 }
 0x255   :  { %290 = vrsqrt.f32 %v214_v44  ;;  %v211_v47 = vsub.f32 %v207_v46, %v209_v45 }
 0x257   :  { %v215_v48 = vadd.f32 1e-05, %v211_v47 }
 0x259   :  { %292 = vrsqrt.f32 %v215_v48 }
 0x25f   :  { %v291_v50 = vpop.eup %290 }
 0x260   :  { %v218_v52 = vmul.f32 %v291_v50, %v212_v49 }
 0x262   :  { %v226_v54 = vmul.f32 %v252_v51, %v218_v52 }
 0x263   :  { %v293_v56 = vpop.eup %292 }
 0x264   :  { %v234_v57 = vadd.f32 %v253_v53, %v226_v54  ;;  %v219_v58 = vmul.f32 %v293_v56, %v213_v55 }
 0x266   :  { %236 = vst.msk [vmem:[%s392_s7] sm:$0xff] %vm64_vm1, %v234_v57  ;;  %v227_v59 = vmul.f32 %v252_v51, %v219_v58 }
 0x268   :  { %v235_v60 = vadd.f32 %v253_v53, %v227_v59 }
 0x26a   :  { %237 = vst.msk [vmem:[%s392_s7 + $0x8] sm:$0xff] %vm64_vm1, %v235_v60 }

// kernel: transformer_forward.10
= control target key start
LH: loop header
LB: loop body
LE: loop exit
PB: predicated region body
PF: predicated region fallthrough
CT: control target
= control target key end

     0   :  { %s1385_s13 = smov 0   ;;  %s1522_s0 = inlined_call_operand.vmem [shape: f32[2,8,32], index: 0, kind: input, shape index: {}]   ;;  %s1523_s1 = inlined_call_operand.vmem [shape: f32[2,8,32], index: 1, kind: input, shape index: {}]   ;;  %s1524_s2 = inlined_call_operand.vmem [shape: bf16[32,64], index: 2, kind: input, shape index: {}]   ;;  %s1525_s3 = inlined_call_operand.vmem [shape: f32[1,64], index: 3, kind: input, shape index: {}]   ;;  %s1526_s4 = inlined_call_operand.vmem [shape: bf16[32,32], index: 4, kind: input, shape index: {}]   ;;  %s1527_s5 = inlined_call_operand.vmem [shape: f32[1,32], index: 5, kind: input, shape index: {}]   ;;  %s1528_s6 = inlined_call_operand.vmem [shape: bf16[32,32], index: 6, kind: input, shape index: {}]   ;;  %s1529_s7 = inlined_call_operand.vmem [shape: f32[1,32], index: 7, kind: input, shape index: {}]   ;;  %s1530_s8 = inlined_call_operand.vmem [shape: f32[1,32], index: 8, kind: input, shape index: {}]   ;;  %s1531_s9 = inlined_call_operand.vmem [shape: f32[1,32], index: 9, kind: input, shape index: {}]   ;;  %s1532_s10 = inlined_call_operand.vmem [shape: f32[2,8,32], index: 10, kind: output, shape index: {}]  }
   0x1 LB: > { %s1137_s14 = sadd.s32 4294967295, %s1316_s13   ;;  %p1141_p0 = scmp.ge.s32.totalorder %s1316_s13, 1  ;;  %s1316_s13 = sphi %s1385_s13, %s20_s13  }
   0x2   : > { %p320_p1 = scmp.lt.s32.totalorder %s1316_s13, 3 }
   0x4   : > { %p321_p2 = pnand %p1141_p0, %p320_p1 }
   0x5   : > { %v1286_v0 = vld [vmem:[%s1524_s2] sm:$0xff] (!%p321_p2)   ;;  %v1318_v1 = vmov (!%p321_p2), 0.0   ;;  %v1287_v2 = vld [vmem:[%s1524_s2 + $0x8] sm:$0xff] (!%p321_p2)   ;;  %vm1319_vm0 = vmmov (!%p321_p2), 0   ;;  %p360_p3 = scmp.lt.s32.totalorder (!%p321_p2), %s1137_s14, 1  ;;  %vm401_vm1 = vcmask (!%p321_p2), 261120  }
   0x6   : > { %324 = sbr.rel (%p321_p2) target bundleno = 1663 (0x67f), region = 60  ;;  %1194 = vmatprep.subr.bf16.mxu0 (!%p321_p2), %v1318_v1  ;;  %1202 = vmatprep.subr.bf16.mxu1 (!%p321_p2), %v1318_v1  ;;  %v1145_v7 = vld [vmem:[%s1525_s3] ss:$0 sm:$0xff] (!%p321_p2)  ;;  %s1320_s28 = smov (!%p321_p2), 120   ;;  %v1289_v15 = vld [vmem:[%s1526_s4 + $0x8] sm:$0xff] (!%p321_p2)   ;;  %vm516_vm2 = vcmask (!%p321_p2), 64512  }
   0x7   : > { %1195 = vmatpush3.bf16.msra.mxu0 (!%p321_p2), %v1286_v0  ;;  %1198 = vmatprep.mubr.msk.bf16.mxu0 (!%p321_p2), %vm1319_vm0, %v1318_v1  ;;  %s1321_s29 = smov (!%p321_p2), 96   ;;  %s1322_s30 = smov (!%p321_p2), 80   ;;  %v1288_v14 = vld [vmem:[%s1526_s4] sm:$0xff] (!%p321_p2)   ;;  %vm578_vm3 = vcmask (!%p321_p2), 1043456   ;;  %vm966_vm4 = vcmask (!%p321_p2), 130048   ;;  %vm968_vm5 = vcmask (!%p321_p2), 195584  }
   0x8   : > { %1196 = vmatprep.subr.bf16.mxu0 (!%p321_p2), %v1318_v1  ;;  %1206 = vmatprep.mubr.msk.bf16.mxu1 (!%p321_p2), %vm1319_vm0, %v1318_v1  ;;  %s1323_s11 = smov (!%p321_p2), 88   ;;  %s1324_s12 = smov (!%p321_p2), 72   ;;  %v1149_v48 = vld [vmem:[%s1527_s5] ss:$0 sm:$0xff] (!%p321_p2) }
   0x9   : > { %s1326_s15 = smov (!%p321_p2), 104   ;;  %1203 = vmatpush3.bf16.msra.mxu1 (!%p321_p2), %v1288_v14  ;;  %s1328_s26 = smov (!%p321_p2), 16  }
   0xa   : > { %1204 = vmatprep.subr.bf16.mxu1 (!%p321_p2), %v1318_v1 }
   0xb   : > { %1197 = vmatpush3.bf16.msra.mxu0 (!%p321_p2), %v1287_v2 }
   0xc   : > { %1210 = vmatprep.subr.bf16.mxu0 (!%p321_p2), %v1318_v1 }
   0xd   : > { %s1534_s14 = smov (!%p360_p3, %s1137_s14), 1  ;;  %1205 = vmatpush3.bf16.msra.mxu1 %v1289_v15 }
   0xe   : > { %s1406_s19 = sshll.u32 %s1534_s14, 3  ;;  %s1325_s14 = smov 112   ;;  %1216 = vmatprep.subr.bf16.mxu1 %v1318_v1 }
   0xf   : > { %s363_s22 = scalar_lea.vmem %s1522_s0, %s1406_s19  ;;  %s367_s25 = scalar_lea.vmem %s1523_s1, %s1406_s19 }
  0x10   : > { %v1417_v3 = vld [vmem:[%s363_s22] sm:$0xff]  ;;  %s371_s20 = scalar_lea.vmem %s1532_s10, %s1406_s19 }
  0x11   : > { %v374_v4 = vld [vmem:[%s367_s25] sm:$0xff]  ;;  %v377_v16 = vpack.c.bf16 %v1417_v3, %v1417_v3  ;;  %s1327_s25 = smov 8  }
  0x12   : > { %v375_v5 = vadd.f32 %v374_v4, %v1417_v3 }
  0x13   : > { %1207 = vmatmul.mubr.msk.bf16.vlgmr.msra.gmra.mrb[0].mxu1 %vm401_vm1, %v377_v16 }
  0x14   : > { %v376_v6 = vpack.c.bf16 %v375_v5, %v375_v5  ;;  %1218 = vmatprep.mubr.msk.bf16.mxu1 %vm1319_vm0, %v1318_v1 }
  0x16   : > { %1199 = vmatmul.mubr.msk.bf16.vlgmr.msra.gmra.mrb[0].mxu0 %vm401_vm1, %v376_v6 }
  0x17   : > { %1212 = vmatprep.mubr.msk.bf16.mxu0 %vm1319_vm0, %v1318_v1 }
  0xe6   : > { %v505_v49 = vpop.f32.mrb[0].mxu1 }
  0xe7   : > { %v506_v50 = vadd.f32 %v1149_v48, %v505_v49  ;;  %v1208_v51 = vpop.f32.mrb[1].mxu1  ;;  %v1291_v49 = vld [vmem:[%s1528_s6 + $0x8] sm:$0xff]  }
  0xe8   : > { %v508_v52 = vpop.f32.mrb[2].mxu1 }
  0xe9   : > { %v439_v8 = vpop.f32.mrb[0].mxu0  ;;  %v1209_v53 = vpop.f32.mrb[3].mxu1  ;;  %v512_v54 = vpack.c.bf16 %v506_v50, %v506_v50 }
  0xea   : > { %v440_v9 = vadd.f32 %v1145_v7, %v439_v8  ;;  %v1200_v10 = vpop.f32.mrb[1].mxu0 }
  0xeb   : > { %v442_v11 = vpop.f32.mrb[2].mxu0  ;;  %v580_v55 = vsel %vm578_vm3, %v512_v54, 0 }
  0xec   : > { %v511_v12 = vpack.c.bf16 %v440_v9, %v440_v9  ;;  %v1201_v13 = vpop.f32.mrb[3].mxu0  ;;  %1217 = vmatpush3.bf16.msra.mxu1 %v580_v55 }
  0xed   : > { %1228 = vmatprep.subr.bf16.mxu1 %v1318_v1 }
  0xee   : > { %622 = vrot.lane.b32.xlu1 %v511_v12, %s1320_s28  ;;  %514 = vrot.lane.b32.xlu0 %v511_v12, %s1321_s29  ;;  %s1329_s29 = smov 24  }
  0xf2   : > { %735 = vrot.lane.b32.xlu1 %v511_v12, %s1322_s30  ;;  %624 = vrot.lane.b32.xlu0 %v511_v12, %s1323_s11 }
  0xf6   : > { %845 = vrot.lane.b32.xlu1 %v511_v12, %s1324_s12  ;;  %733 = vrot.lane.b32.xlu0 %v511_v12, %s1325_s14 }
  0xfa   : > { %843 = vrot.lane.b32.xlu0 %v511_v12, %s1326_s15 }
 0x160   : > { %v515_v17 = vpop.permute.xlu0 %514  ;;  %v623_v20 = vpop.permute.xlu1 %622 }
 0x161   : > { %v521_v18 = vsel %vm516_vm2, %v515_v17, 0 }
 0x162   : > { %1211 = vmatpush3.bf16.xpose.msra.mxu0 %v521_v18 }
 0x163   : > { %1222 = vmatprep.subr.bf16.mxu0 %v1318_v1 }
 0x164   : > { %v625_v19 = vpop.permute.xlu0 %624  ;;  %v736_v22 = vpop.permute.xlu1 %735 }
 0x165   : > { %v630_v21 = vsel %vm516_vm2, %v625_v19, 0  ;;  %v741_v23 = vsel %vm516_vm2, %v736_v22, 0 }
 0x168   : > { %v846_v24 = vpop.permute.xlu1 %845  ;;  %v734_v25 = vpop.permute.xlu0 %733 }
 0x169   : > { %1213 = vmatmul.mubr.msk.bf16.vlgmr.msra.gmra.mrb[4].mxu0 %vm516_vm2, %v511_v12  ;;  %v851_v26 = vsel %vm516_vm2, %v846_v24, 0 }
 0x16a   : > { %1223 = vmatpush3.bf16.xpose.msra.mxu0 %v630_v21  ;;  %1224 = vmatprep.mubr.msk.bf16.mxu0 %vm1319_vm0, %v1318_v1 }
 0x16b   : > { %1234 = vmatprep.subr.bf16.mxu0 %v1318_v1 }
 0x16c   : > { %v844_v27 = vpop.permute.xlu0 %843 }
 0x171   : > { %1225 = vmatmul.mubr.msk.bf16.vlgmr.msra.gmra.mrb[8].mxu0 %vm516_vm2, %v623_v20 }
 0x172   : > { %1235 = vmatpush3.bf16.xpose.msra.mxu0 %v741_v23  ;;  %1236 = vmatprep.mubr.msk.bf16.mxu0 %vm1319_vm0, %v1318_v1 }
 0x173   : > { %1246 = vmatprep.subr.bf16.mxu0 %v1318_v1 }
 0x179   : > { %1237 = vmatmul.mubr.msk.bf16.vlgmr.msra.gmra.mrb[12].mxu0 %vm516_vm2, %v734_v25 }
 0x17a   : > { %1247 = vmatpush3.bf16.xpose.msra.mxu0 %v851_v26  ;;  %1248 = vmatprep.mubr.msk.bf16.mxu0 %vm1319_vm0, %v1318_v1 }
 0x17b   : > { %1258 = vmatprep.subr.bf16.mxu0 %v1318_v1 }
 0x181   : > { %1249 = vmatmul.mubr.msk.bf16.vlgmr.msra.gmra.mrb[16].mxu0 %vm516_vm2, %v844_v27 }
 0x182   : > { %1262 = vmatprep.mubr.msk.bf16.mxu0 %vm1319_vm0, %v1318_v1 }
 0x23c   : > { %v557_v28 = vpop.f32.mrb[4].mxu0 }
 0x23d   : > { %v1214_v29 = vpop.f32.mrb[5].mxu0  ;;  %v563_v30 = vsel %vm516_vm2, %v557_v28, -inf }
 0x23e   : > { %564 = vmax.xlane.f32.xlu1 %v563_v30  ;;  %v560_v31 = vpop.f32.mrb[6].mxu0 }
 0x23f   : > { %v1215_v32 = vpop.f32.mrb[7].mxu0 }
 0x244   : > { %v666_v33 = vpop.f32.mrb[8].mxu0 }
 0x245   : > { %v1226_v34 = vpop.f32.mrb[9].mxu0  ;;  %v672_v35 = vsel %vm516_vm2, %v666_v33, -inf }
 0x246   : > { %673 = vmax.xlane.f32.xlu0 %v672_v35  ;;  %v669_v36 = vpop.f32.mrb[10].mxu0 }
 0x247   : > { %v1227_v37 = vpop.f32.mrb[11].mxu0 }
 0x24c   : > { %v777_v38 = vpop.f32.mrb[12].mxu0 }
 0x24d   : > { %v1238_v39 = vpop.f32.mrb[13].mxu0  ;;  %v783_v40 = vsel %vm516_vm2, %v777_v38, -inf }
 0x24e   : > { %784 = vmax.xlane.f32.xlu0 %v783_v40  ;;  %v780_v41 = vpop.f32.mrb[14].mxu0  ;;  %v1290_v40 = vld [vmem:[%s1528_s6] sm:$0xff]  }
 0x24f   : > { %v1239_v42 = vpop.f32.mrb[15].mxu0  ;;  %1259 = vmatpush3.bf16.msra.mxu0 %v1290_v40 }
 0x250   : > { %1260 = vmatprep.subr.bf16.mxu0 %v1318_v1 }
 0x253   : > { %1261 = vmatpush3.bf16.msra.mxu0 %v1291_v49 }
 0x254   : > { %v887_v43 = vpop.f32.mrb[16].mxu0 }
 0x255   : > { %v1250_v44 = vpop.f32.mrb[17].mxu0  ;;  %v893_v45 = vsel %vm516_vm2, %v887_v43, -inf }
 0x256   : > { %894 = vmax.xlane.f32.xlu1 %v893_v45  ;;  %v890_v46 = vpop.f32.mrb[18].mxu0 }
 0x257   : > { %v1251_v47 = vpop.f32.mrb[19].mxu0 }
 0x2cb   : > { %v565_v56 = vpop.xlane.xlu1 %564 }
 0x2cc   : > { %v566_v57 = vsub.f32 %v557_v28, %v565_v56 }
 0x2ce   : > { %v567_v58 = vmul.f32 1.442695, %v566_v57 }
 0x2d0   : > { %1292 = vpow2.f32 %v567_v58 }
 0x2d3   : > { %v674_v59 = vpop.xlane.xlu0 %673 }
 0x2d4   : > { %v675_v60 = vsub.f32 %v666_v33, %v674_v59 }
 0x2d6   : > { %v676_v61 = vmul.f32 1.442695, %v675_v60  ;;  %v1161_v60 = vld [vmem:[%s1529_s7] ss:$0 sm:$0xff] }
 0x2d8   : > { %1294 = vpow2.f32 %v676_v61  ;;  %v978_v61 = vadd.f32 %v1161_v60, %v1417_v3 }
 0x2da   : > { %v1293_v62 = vpop.eup %1292 }
 0x2db   : > { %v785_v63 = vpop.xlane.xlu0 %784  ;;  %v569_v0 = vsel %vm516_vm2, %v1293_v62, 0.0 }
 0x2dc   : > { %v786_v2 = vsub.f32 %v777_v38, %v785_v63  ;;  %570 = vadd.xlane.f32.xlu0 %v569_v0 }
 0x2de   : > { %v787_v4 = vmul.f32 1.442695, %v786_v2 }
 0x2e0   : > { %1296 = vpow2.f32 %v787_v4 }
 0x2e2   : > { %v1295_v5 = vpop.eup %1294 }
 0x2e3   : > { %v678_v6 = vsel %vm516_vm2, %v1295_v5, 0.0  ;;  %v895_v9 = vpop.xlane.xlu1 %894 }
 0x2e4   : > { %679 = vadd.xlane.f32.xlu1 %v678_v6  ;;  %v896_v10 = vsub.f32 %v887_v43, %v895_v9 }
 0x2e6   : > { %v897_v11 = vmul.f32 1.442695, %v896_v10 }
 0x2e8   : > { %1298 = vpow2.f32 %v897_v11 }
 0x2ea   : > { %v1297_v7 = vpop.eup %1296 }
 0x2eb   : > { %v789_v8 = vsel %vm516_vm2, %v1297_v7, 0.0 }
 0x2ec   : > { %790 = vadd.xlane.f32.xlu0 %v789_v8 }
 0x2f2   : > { %v1299_v12 = vpop.eup %1298 }
 0x2f3   : > { %v899_v13 = vsel %vm516_vm2, %v1299_v12, 0.0 }
 0x2f5   : > { %795 = vrot.lane.b32.xlu1 %v512_v54, %s1325_s14 }
 0x302   : > { %685 = vrot.lane.b32.xlu0 %v512_v54, %s1320_s28 }
 0x319   : > { %900 = vadd.xlane.f32.xlu1 %v899_v13 }
 0x32a   : > { %905 = vrot.lane.b32.xlu1 %v512_v54, %s1326_s15 }
 0x369   : > { %v571_v14 = vpop.xlane.xlu0 %570 }
 0x36a   : > { %1300 = vrcp.f32 %v571_v14 }
 0x371   : > { %v680_v15 = vpop.xlane.xlu1 %679 }
 0x372   : > { %1302 = vrcp.f32 %v680_v15 }
 0x374   : > { %v1301_v16 = vpop.eup %1300 }
 0x375   : > { %v573_v17 = vmul.f32 %v1301_v16, %v1293_v62  ;;  %v796_v24 = vpop.permute.xlu1 %795  ;;  %v1165_v16 = vld [vmem:[%s1530_s8] ss:$0 sm:$0xff] }
 0x376   : > { %v801_v26 = vsel %vm578_vm3, %v796_v24, 0 }
 0x377   : > { %v574_v18 = vpack.c.bf16 %v573_v17, %v573_v17 }
 0x379   : > { %1219 = vmatmul.mubr.msk.bf16.vlgmr.msra.gmra.mrb[4].mxu1 %vm516_vm2, %v574_v18  ;;  %v791_v19 = vpop.xlane.xlu0 %790  ;;  %v1166_v18 = vld [vmem:[%s1531_s9] ss:$0 sm:$0xff] }
 0x37a   : > { %1304 = vrcp.f32 %v791_v19  ;;  %1230 = vmatprep.mubr.msk.bf16.mxu1 %vm1319_vm0, %v1318_v1 }
 0x37c   : > { %v1303_v20 = vpop.eup %1302 }
 0x37d   : > { %v682_v21 = vmul.f32 %v1303_v20, %v1295_v5  ;;  %v686_v22 = vpop.permute.xlu0 %685 }
 0x37e   : > { %v691_v23 = vsel %vm578_vm3, %v686_v22, 0 }
 0x37f   : > { %1229 = vmatpush3.bf16.msra.mxu1 %v691_v23  ;;  %v683_v25 = vpack.c.bf16 %v682_v21, %v682_v21 }
 0x380   : > { %1240 = vmatprep.subr.bf16.mxu1 %v1318_v1 }
 0x382   : > { %1231 = vmatmul.mubr.msk.bf16.vlgmr.msra.gmra.mrb[8].mxu1 %vm516_vm2, %v683_v25 }
 0x383   : > { %1241 = vmatpush3.bf16.msra.mxu1 %v801_v26  ;;  %1242 = vmatprep.mubr.msk.bf16.mxu1 %vm1319_vm0, %v1318_v1 }
 0x384   : > { %v1305_v27 = vpop.eup %1304  ;;  %1252 = vmatprep.subr.bf16.mxu1 %v1318_v1 }
 0x385   : > { %v793_v28 = vmul.f32 %v1305_v27, %v1297_v7 }
 0x387   : > { %v794_v29 = vpack.c.bf16 %v793_v28, %v793_v28 }
 0x38a   : > { %1243 = vmatmul.mubr.msk.bf16.vlgmr.msra.gmra.mrb[12].mxu1 %vm516_vm2, %v794_v29 }
 0x38b   : > { %1254 = vmatprep.mubr.msk.bf16.mxu1 %vm1319_vm0, %v1318_v1 }
 0x3a6   : > { %v901_v30 = vpop.xlane.xlu1 %900 }
 0x3a7   : > { %1306 = vrcp.f32 %v901_v30 }
 0x3aa   : > { %v906_v31 = vpop.permute.xlu1 %905 }
 0x3ab   : > { %v911_v32 = vsel %vm578_vm3, %v906_v31, 0 }
 0x3ac   : > { %1253 = vmatpush3.bf16.msra.mxu1 %v911_v32 }
 0x3b1   : > { %v1307_v33 = vpop.eup %1306 }
 0x3b2   : > { %v903_v34 = vmul.f32 %v1307_v33, %v1299_v12 }
 0x3b4   : > { %v904_v35 = vpack.c.bf16 %v903_v34, %v903_v34 }
 0x3b6   : > { %1255 = vmatmul.mubr.msk.bf16.vlgmr.msra.gmra.mrb[16].mxu1 %vm516_vm2, %v904_v35 }
 0x44c   : > { %v616_v36 = vpop.f32.mrb[4].mxu1 }
 0x44d   : > { %v1220_v37 = vpop.f32.mrb[5].mxu1 }
 0x44e   : > { %v619_v38 = vpop.f32.mrb[6].mxu1 }
 0x44f   : > { %v1221_v39 = vpop.f32.mrb[7].mxu1 }
 0x455   : > { %v727_v41 = vpop.f32.mrb[8].mxu1 }
 0x456   : > { %954 = vrot.lane.b32.xlu0 %v727_v41, %s1327_s25  ;;  %v1232_v42 = vpop.f32.mrb[9].mxu1 }
 0x457   : > { %v730_v43 = vpop.f32.mrb[10].mxu1 }
 0x458   : > { %v1233_v44 = vpop.f32.mrb[11].mxu1 }
 0x45d   : > { %v837_v45 = vpop.f32.mrb[12].mxu1 }
 0x45e   : > { %958 = vrot.lane.b32.xlu1 %v837_v45, %s1328_s26  ;;  %v1244_v46 = vpop.f32.mrb[13].mxu1 }
 0x45f   : > { %v840_v47 = vpop.f32.mrb[14].mxu1 }
 0x460   : > { %v1245_v48 = vpop.f32.mrb[15].mxu1 }
 0x489   : > { %v947_v50 = vpop.f32.mrb[16].mxu1 }
 0x48a   : > { %962 = vrot.lane.b32.xlu0 %v947_v50, %s1329_s29  ;;  %v1256_v1 = vpop.f32.mrb[17].mxu1 }
 0x48b   : > { %v950_v51 = vpop.f32.mrb[18].mxu1 }
 0x48c   : > { %v1257_v52 = vpop.f32.mrb[19].mxu1 }
 0x4c8   : > { %v955_v53 = vpop.permute.xlu0 %954 }
 0x4c9   : > { %v965_v55 = vsel %vm516_vm2, %v616_v36, %v955_v53 }
 0x4d0   : > { %v959_v54 = vpop.permute.xlu1 %958 }
 0x4d1   : > { %v967_v56 = vsel %vm966_vm4, %v965_v55, %v959_v54 }
 0x4fc   : > { %v963_v57 = vpop.permute.xlu0 %962 }
 0x4fd   : > { %v969_v58 = vsel %vm968_vm5, %v967_v56, %v963_v57 }
 0x4fe   : > { %v970_v59 = vpack.c.bf16 %v969_v58, %v969_v58 }
 0x500   : > { %1263 = vmatmul.mubr.msk.bf16.vlgmr.msra.gmra.mrb[20].mxu0 %vm401_vm1, %v970_v59 }
 0x5d3   : > { %v1032_v62 = vpop.f32.mrb[20].mxu0 }
 0x5d4   : > { %v1038_v63 = vadd.f32 %v1032_v62, %v978_v61  ;;  %v1264_v0 = vpop.f32.mrb[21].mxu0 }
 0x5d5   : > { %v1035_v2 = vpop.f32.mrb[22].mxu0 }
 0x5d6   : > { %v1265_v4 = vpop.f32.mrb[23].mxu0  ;;  %v1041_v5 = vsel %vm401_vm1, %v1038_v63, 0.0  ;;  %v1046_v6 = vmul.f32 %v1038_v63, %v1038_v63 }
 0x5d7   : > { %1042 = vadd.xlane.f32.xlu1 %v1041_v5 }
 0x5d8   : > { %v1047_v7 = vsel %vm401_vm1, %v1046_v6, 0.0 }
 0x5d9   : > { %1048 = vadd.xlane.f32.xlu0 %v1047_v7 }
 0x664   : > { %v1043_v8 = vpop.xlane.xlu1 %1042 }
 0x665   : > { %v1045_v9 = vmul.f32 0.03125, %v1043_v8 }
 0x666   : > { %v1049_v10 = vpop.xlane.xlu0 %1048 }
 0x667   : > { %v1051_v11 = vmul.f32 %v1045_v9, %v1045_v9  ;;  %v1050_v12 = vmul.f32 0.03125, %v1049_v10  ;;  %v1053_v14 = vsub.f32 %v1038_v63, %v1045_v9 }
 0x669   : > { %v1052_v13 = vsub.f32 %v1050_v12, %v1051_v11 }
 0x66b   : > { %v1054_v3 = vadd.f32 1e-05, %v1052_v13 }
 0x66d   : > { %1308 = vrsqrt.f32 %v1054_v3 }
 0x677   : > { %v1309_v15 = vpop.eup %1308 }
 0x678   : > { %v1056_v17 = vmul.f32 %v1309_v15, %v1053_v14 }
 0x67a   : > { %v1063_v19 = vmul.f32 %v1165_v16, %v1056_v17 }
 0x67c   : > { %v1070_v20 = vadd.f32 %v1166_v18, %v1063_v19 }
 0x67e   : > { %1071 = vst.msk [vmem:[%s371_s20] sm:$0xff] %vm401_vm1, %v1070_v20 }
 0x67f PF: > { %s20_s13 = sadd.s32 1, %s1316_s13  }
 0x680   : > { %p17_p4 = scmp.ge.s32.totalorder %s20_s13, 4  }
 0x682   :  { %19 = sbr.rel (!%p17_p4) target bundleno = 1 (0x1), region = 93 }

// kernel: transformer_forward.19
= control target key start
LH: loop header
LB: loop body
LE: loop exit
PB: predicated region body
PF: predicated region fallthrough
CT: control target
= control target key end

     0   :  { %v354_v0 = vmov 0.0   ;;  %vm355_vm0 = vmmov 0   ;;  %vm70_vm1 = vcmask 261120   ;;  %vm148_vm2 = vcmask 523264   ;;  %s465_s1 = inlined_call_operand.vmem [shape: bf16[32,64], index: 1, kind: input, shape index: {}]   ;;  %s466_s0 = inlined_call_operand.vmem [shape: f32[16,32], index: 0, kind: input, shape index: {}]   ;;  %s467_s3 = inlined_call_operand.vmem [shape: bf16[64,32], index: 3, kind: input, shape index: {}]   ;;  %s468_s2 = inlined_call_operand.vmem [shape: f32[1,64], index: 2, kind: input, shape index: {}]   ;;  %s469_s4 = inlined_call_operand.vmem [shape: f32[1,32], index: 4, kind: input, shape index: {}]   ;;  %s470_s5 = inlined_call_operand.vmem [shape: f32[1,32], index: 5, kind: input, shape index: {}]   ;;  %s471_s6 = inlined_call_operand.vmem [shape: f32[1,32], index: 6, kind: input, shape index: {}]   ;;  %s472_s7 = inlined_call_operand.vmem [shape: f32[1,32], index: 7, kind: input, shape index: {}]   ;;  %s473_s8 = inlined_call_operand.vmem [shape: f32[1,32], index: 8, kind: input, shape index: {}]   ;;  %s474_s9 = inlined_call_operand.vmem [shape: f32[16,32], index: 9, kind: output, shape index: {}]  }
   0x1   :  { %318 = vmatprep.subr.bf16.mxu0 %v354_v0  ;;  %v340_v1 = vld [vmem:[%s465_s1] sm:$0xff]   ;;  %322 = vmatprep.mubr.msk.bf16.mxu0 %vm355_vm0, %v354_v0  ;;  %v341_v2 = vld [vmem:[%s465_s1 + $0x8] sm:$0xff]   ;;  %v344_v8 = vld [vmem:[%s467_s3 + $0x10] sm:$0xff]  }
   0x2   :  { %326 = vmatprep.subr.bf16.mxu1 %v354_v0  ;;  %334 = vmatprep.mubr.msk.bf16.mxu1 %vm355_vm0, %v354_v0  ;;  %v33_v3 = vld [vmem:[%s466_s0] sm:$0xff]  ;;  %v34_v4 = vld [vmem:[%s466_s0 + $0x8] sm:$0xff]  ;;  %v345_v9 = vld [vmem:[%s467_s3 + $0x18] sm:$0xff]  }
   0x3   :  { %319 = vmatpush3.bf16.msra.mxu0 %v340_v1  ;;  %v342_v5 = vld [vmem:[%s467_s3] sm:$0xff]   ;;  %v343_v6 = vld [vmem:[%s467_s3 + $0x8] sm:$0xff]   ;;  %v51_v7 = vpack.c.bf16 %v34_v4, %v33_v3 }
   0x4   :  { %320 = vmatprep.subr.bf16.mxu0 %v354_v0  ;;  %327 = vmatpush3.bf16.msra.mxu1 %v342_v5  ;;  %v296_v10 = vld [vmem:[%s468_s2] ss:$0 sm:$0xff] }
   0x5   :  { %328 = vmatprep.subr.bf16.mxu1 %v354_v0  ;;  %v300_v20 = vld [vmem:[%s469_s4] ss:$0 sm:$0xff] }
   0x6   :  { %v306_v51 = vld [vmem:[%s470_s5] ss:$0 sm:$0xff] }
   0x7   :  { %321 = vmatpush3.bf16.msra.mxu0 %v341_v2  ;;  %v307_v53 = vld [vmem:[%s471_s6] ss:$0 sm:$0xff] }
   0x8   :  { %329 = vmatpush3.bf16.msra.mxu1 %v343_v6 }
   0x9   :  { %330 = vmatprep.subr.bf16.mxu1 %v354_v0 }
   0xa   :  { %323 = vmatmul.mubr.msk.bf16.vlgmr.msra.gmra.mrb[0].mxu0 %vm70_vm1, %v51_v7 }
   0xc   :  { %331 = vmatpush3.bf16.msra.mxu1 %v344_v8 }
   0xd   :  { %332 = vmatprep.subr.bf16.mxu1 %v354_v0 }
  0x10   :  { %333 = vmatpush3.bf16.msra.mxu1 %v345_v9 }
  0xdd   :  { %v108_v11 = vpop.f32.mrb[0].mxu0 }
  0xde   :  { %v109_v12 = vadd.f32 %v296_v10, %v108_v11  ;;  %v324_v13 = vpop.f32.mrb[1].mxu0 }
  0xdf   :  { %v111_v14 = vpop.f32.mrb[2].mxu0 }
  0xe0   :  { %v112_v15 = vadd.f32 %v296_v10, %v111_v14  ;;  %v325_v16 = vpop.f32.mrb[3].mxu0  ;;  %v115_v17 = vmax.f32 %v109_v12, 0.0 }
  0xe2   :  { %v116_v18 = vmax.f32 %v112_v15, 0.0 }
  0xe4   :  { %v117_v19 = vpack.c.bf16 %v116_v18, %v115_v17 }
  0xe6   :  { %335 = vmatmul.mubr.msk.bf16.vlgmr.msra.gmra.mrb[0].mxu1 %vm148_vm2, %v117_v19  ;;  %v308_v19 = vld [vmem:[%s472_s7] ss:$0 sm:$0xff] }
 0x1b9   :  { %v186_v21 = vpop.f32.mrb[0].mxu1 }
 0x1ba   :  { %v187_v22 = vadd.f32 %v300_v20, %v186_v21  ;;  %v336_v23 = vpop.f32.mrb[1].mxu1  ;;  %v309_v21 = vld [vmem:[%s473_s8] ss:$0 sm:$0xff] }
 0x1bb   :  { %v189_v24 = vpop.f32.mrb[2].mxu1 }
 0x1bc   :  { %v193_v25 = vadd.f32 %v187_v22, %v33_v3  ;;  %v190_v26 = vadd.f32 %v300_v20, %v189_v24  ;;  %v337_v27 = vpop.f32.mrb[3].mxu1 }
 0x1be   :  { %v194_v28 = vadd.f32 %v190_v26, %v34_v4  ;;  %v195_v29 = vsel %vm70_vm1, %v193_v25, 0.0  ;;  %v204_v30 = vmul.f32 %v193_v25, %v193_v25 }
 0x1bf   :  { %196 = vadd.xlane.f32.xlu0 %v195_v29 }
 0x1c0   :  { %v206_v31 = vsel %vm70_vm1, %v204_v30, 0.0  ;;  %v205_v32 = vmul.f32 %v194_v28, %v194_v28  ;;  %v198_v33 = vsel %vm70_vm1, %v194_v28, 0.0 }
 0x1c1   :  { %207 = vadd.xlane.f32.xlu1 %v206_v31 }
 0x1c2   :  { %v209_v34 = vsel %vm70_vm1, %v205_v32, 0.0 }
 0x1c3   :  { %199 = vadd.xlane.f32.xlu0 %v198_v33 }
 0x1c5   :  { %210 = vadd.xlane.f32.xlu1 %v209_v34 }
 0x24c   :  { %v197_v35 = vpop.xlane.xlu0 %196 }
 0x24d   :  { %v202_v36 = vmul.f32 0.03125, %v197_v35 }
 0x24e   :  { %v208_v37 = vpop.xlane.xlu1 %207 }
 0x24f   :  { %v214_v38 = vmul.f32 %v202_v36, %v202_v36  ;;  %v212_v39 = vmul.f32 0.03125, %v208_v37  ;;  %v218_v49 = vsub.f32 %v193_v25, %v202_v36 }
 0x250   :  { %v200_v40 = vpop.xlane.xlu0 %199 }
 0x251   :  { %v216_v41 = vsub.f32 %v212_v39, %v214_v38  ;;  %v203_v42 = vmul.f32 0.03125, %v200_v40 }
 0x252   :  { %v211_v43 = vpop.xlane.xlu1 %210 }
 0x253   :  { %v220_v44 = vadd.f32 1e-05, %v216_v41  ;;  %v215_v45 = vmul.f32 %v203_v42, %v203_v42  ;;  %v213_v46 = vmul.f32 0.03125, %v211_v43  ;;  %v219_v54 = vsub.f32 %v194_v28, %v203_v42 }
 0x255   :  { %346 = vrsqrt.f32 %v220_v44  ;;  %v217_v47 = vsub.f32 %v213_v46, %v215_v45 }
 0x257   :  { %v221_v48 = vadd.f32 1e-05, %v217_v47 }
 0x259   :  { %348 = vrsqrt.f32 %v221_v48 }
 0x25f   :  { %v347_v50 = vpop.eup %346 }
 0x260   :  { %v224_v52 = vmul.f32 %v347_v50, %v218_v49 }
 0x262   :  { %v232_v55 = vmul.f32 %v306_v51, %v224_v52 }
 0x263   :  { %v349_v56 = vpop.eup %348 }
 0x264   :  { %v240_v57 = vadd.f32 %v307_v53, %v232_v55  ;;  %v225_v58 = vmul.f32 %v349_v56, %v219_v54 }
 0x266   :  { %v244_v59 = vsel %vm70_vm1, %v240_v57, 0.0  ;;  %v252_v60 = vmul.f32 %v240_v57, %v240_v57  ;;  %v233_v61 = vmul.f32 %v306_v51, %v225_v58 }
 0x267   :  { %245 = vadd.xlane.f32.xlu0 %v244_v59 }
 0x268   :  { %v241_v62 = vadd.f32 %v307_v53, %v233_v61  ;;  %v254_v63 = vsel %vm70_vm1, %v252_v60, 0.0 }
 0x26a   :  { %v247_v0 = vsel %vm70_vm1, %v241_v62, 0.0  ;;  %v253_v1 = vmul.f32 %v241_v62, %v241_v62 }
 0x26b   :  { %255 = vadd.xlane.f32.xlu0 %v254_v63  ;;  %248 = vadd.xlane.f32.xlu1 %v247_v0 }
 0x26c   :  { %v257_v2 = vsel %vm70_vm1, %v253_v1, 0.0 }
 0x26f   :  { %258 = vadd.xlane.f32.xlu1 %v257_v2 }
 0x2f4   :  { %v246_v3 = vpop.xlane.xlu0 %245 }
 0x2f5   :  { %v250_v4 = vmul.f32 0.03125, %v246_v3 }
 0x2f7   :  { %v262_v7 = vmul.f32 %v250_v4, %v250_v4  ;;  %v266_v17 = vsub.f32 %v240_v57, %v250_v4 }
 0x2f8   :  { %v249_v5 = vpop.xlane.xlu1 %248  ;;  %v256_v6 = vpop.xlane.xlu0 %255 }
 0x2f9   :  { %v251_v8 = vmul.f32 0.03125, %v249_v5  ;;  %v260_v9 = vmul.f32 0.03125, %v256_v6 }
 0x2fb   :  { %v264_v10 = vsub.f32 %v260_v9, %v262_v7  ;;  %v263_v12 = vmul.f32 %v251_v8, %v251_v8  ;;  %v267_v22 = vsub.f32 %v241_v62, %v251_v8 }
 0x2fc   :  { %v259_v11 = vpop.xlane.xlu1 %258 }
 0x2fd   :  { %v268_v13 = vadd.f32 1e-05, %v264_v10  ;;  %v261_v14 = vmul.f32 0.03125, %v259_v11 }
 0x2ff   :  { %350 = vrsqrt.f32 %v268_v13  ;;  %v265_v15 = vsub.f32 %v261_v14, %v263_v12 }
 0x301   :  { %v269_v16 = vadd.f32 1e-05, %v265_v15 }
 0x303   :  { %352 = vrsqrt.f32 %v269_v16 }
 0x309   :  { %v351_v18 = vpop.eup %350 }
 0x30a   :  { %v272_v20 = vmul.f32 %v351_v18, %v266_v17 }
 0x30c   :  { %v280_v23 = vmul.f32 %v308_v19, %v272_v20 }
 0x30d   :  { %v353_v24 = vpop.eup %352 }
 0x30e   :  { %v288_v25 = vadd.f32 %v309_v21, %v280_v23  ;;  %v273_v26 = vmul.f32 %v353_v24, %v267_v22 }
 0x310   :  { %290 = vst.msk [vmem:[%s474_s9] sm:$0xff] %vm70_vm1, %v288_v25  ;;  %v281_v27 = vmul.f32 %v308_v19, %v273_v26 }
 0x312   :  { %v289_v28 = vadd.f32 %v309_v21, %v281_v27 }
 0x314   :  { %291 = vst.msk [vmem:[%s474_s9 + $0x8] sm:$0xff] %vm70_vm1, %v289_v28 }

// kernel: transformer_forward.15
= control target key start
LH: loop header
LB: loop body
LE: loop exit
PB: predicated region body
PF: predicated region fallthrough
CT: control target
= control target key end

     0   :  { %s1750_s29 = smov 0   ;;  %s1752_s30 = smov 0   ;;  %s1926_s0 = inlined_call_operand.vmem [shape: f32[2,8,32], index: 0, kind: input, shape index: {}]   ;;  %s1927_s1 = inlined_call_operand.vmem [shape: f32[2,8,32], index: 1, kind: input, shape index: {}]   ;;  %s1928_s2 = inlined_call_operand.vmem [shape: f32[2,8,32], index: 2, kind: input, shape index: {}]   ;;  %s1929_s3 = inlined_call_operand.vmem [shape: f32[2,8,32], index: 3, kind: input, shape index: {}]   ;;  %s1930_s4 = inlined_call_operand.vmem [shape: bf16[32,32], index: 4, kind: input, shape index: {}]   ;;  %s1931_s5 = inlined_call_operand.vmem [shape: f32[1,32], index: 5, kind: input, shape index: {}]   ;;  %s1932_s6 = inlined_call_operand.vmem [shape: bf16[32,32], index: 6, kind: input, shape index: {}]   ;;  %s1933_s7 = inlined_call_operand.vmem [shape: f32[1,32], index: 7, kind: input, shape index: {}]   ;;  %s1934_s8 = inlined_call_operand.vmem [shape: bf16[32,32], index: 8, kind: input, shape index: {}]   ;;  %s1935_s9 = inlined_call_operand.vmem [shape: f32[1,32], index: 9, kind: input, shape index: {}]   ;;  %s1936_s10 = inlined_call_operand.vmem [shape: bf16[32,32], index: 10, kind: input, shape index: {}]   ;;  %s1937_s11 = inlined_call_operand.vmem [shape: f32[1,32], index: 11, kind: input, shape index: {}]   ;;  %s1938_s12 = inlined_call_operand.vmem [shape: f32[1,32], index: 12, kind: input, shape index: {}]   ;;  %s1939_s13 = inlined_call_operand.vmem [shape: f32[1,32], index: 13, kind: input, shape index: {}]   ;;  %s1940_s14 = inlined_call_operand.vmem [shape: f32[2,8,32], index: 14, kind: output, shape index: {}]  }
   0x1   :  { %s1754_s15 = smov 0  }
   0x2 LB: > { %s36_s16 = sadd.s32 1, %s1661_s30  ;;  %p1443_p0 = scmp.ge.s32.totalorder %s1665_s15, 1  ;;  %s1665_s15 = sphi %s1754_s15, %s24_s15   ;;  %s1661_s30 = sphi %s1752_s30, %s1942_s30   ;;  %s1657_s29 = sphi %s1750_s29, %s1941_s29  }
   0x3   : > { %p38_p1 = scmp.ge.s32.totalorder %s36_s16, 2  ;;  %p462_p2 = scmp.lt.s32.totalorder %s1665_s15, 3 }
   0x5   : > { %s1944_s16 = smov (%p38_p1, %s36_s16), 0  ;;  %p463_p3 = pnand %p1443_p0, %p462_p2 }
   0x6   : > { %v1617_v0 = vld [vmem:[%s1932_s6] sm:$0xff] (!%p463_p3)   ;;  %v1667_v1 = vmov (!%p463_p3), 0.0   ;;  %v1619_v3 = vld [vmem:[%s1932_s6 + $0x8] sm:$0xff] (!%p463_p3)   ;;  %vm1668_vm0 = vmmov (!%p463_p3), 0   ;;  %p527_p4 = scmp.lt.s32.totalorder (!%p463_p3), %s1657_s29, 1  ;;  %vm589_vm1 = vcmask (!%p463_p3), 261120  }
   0x7   : > { %466 = sbr.rel (%p463_p3) target bundleno = 1620 (0x654), region = 76  ;;  %1513 = vmatprep.subr.bf16.mxu1 (!%p463_p3), %v1667_v1  ;;  %1505 = vmatprep.subr.bf16.mxu0 (!%p463_p3), %v1667_v1  ;;  %v1618_v2 = vld [vmem:[%s1930_s4] sm:$0xff] (!%p463_p3)   ;;  %v1620_v4 = vld [vmem:[%s1930_s4 + $0x8] sm:$0xff] (!%p463_p3)   ;;  %vm768_vm2 = vcmask (!%p463_p3), 64512   ;;  %s1669_s18 = smov (!%p463_p3), 112   ;;  %vm830_vm3 = vcmask (!%p463_p3), 1043456  }
   0x8   : > { %1514 = vmatpush3.bf16.msra.mxu1 (!%p463_p3), %v1617_v0  ;;  %1517 = vmatprep.mubr.msk.bf16.mxu1 (!%p463_p3), %vm1668_vm0, %v1667_v1  ;;  %v1453_v13 = vld [vmem:[%s1933_s7] ss:$0 sm:$0xff] (!%p463_p3)  ;;  %s1671_s20 = smov (!%p463_p3), 104   ;;  %v1622_v29 = vld [vmem:[%s1934_s8 + $0x8] sm:$0xff] (!%p463_p3)   ;;  %s1672_s17 = smov (!%p463_p3), 8   ;;  %vm1220_vm4 = vcmask (!%p463_p3), 130048  }
   0x9   : > { %1515 = vmatprep.subr.bf16.mxu1 (!%p463_p3), %v1667_v1  ;;  %1506 = vmatpush3.bf16.msra.mxu0 (!%p463_p3), %v1618_v2  ;;  %v1449_v15 = vld [vmem:[%s1931_s5] ss:$0 sm:$0xff] (!%p463_p3)  ;;  %vm1222_vm5 = vcmask (!%p463_p3), 195584  }
   0xa   : > { %1507 = vmatprep.subr.bf16.mxu0 (!%p463_p3), %v1667_v1  ;;  %1509 = vmatprep.mubr.msk.bf16.mxu0 (!%p463_p3), %vm1668_vm0, %v1667_v1  ;;  %v1621_v28 = vld [vmem:[%s1934_s8] sm:$0xff] (!%p463_p3)  }
   0xb   : > { %v1457_v45 = vld [vmem:[%s1935_s9] ss:$0 sm:$0xff] (!%p463_p3) }
   0xc   : > { %1516 = vmatpush3.bf16.msra.mxu1 (!%p463_p3), %v1619_v3 }
   0xd   : > { %1508 = vmatpush3.bf16.msra.mxu0 (!%p463_p3), %v1620_v4  ;;  %1529 = vmatprep.subr.bf16.mxu1 (!%p463_p3), %v1667_v1 }
   0xe   : > { %s1946_s29 = smov (!%p527_p4, %s1657_s29), 1  ;;  %1521 = vmatprep.subr.bf16.mxu0 %v1667_v1 }
   0xf   : > { %s1788_s25 = sshll.u32 %s1946_s29, 3  ;;  %s1674_s29 = smov 24  }
  0x10   : > { %s544_s28 = scalar_lea.vmem %s1928_s2, %s1788_s25  ;;  %s548_s19 = scalar_lea.vmem %s1929_s3, %s1788_s25 }
  0x11   : > { %v561_v5 = vld [vmem:[%s544_s28] sm:$0xff]  ;;  %s533_s21 = scalar_lea.vmem %s1926_s0, %s1788_s25  ;;  %s540_s24 = scalar_lea.vmem %s1927_s1, %s1788_s25 }
  0x12   : > { %v562_v6 = vld [vmem:[%s548_s19] sm:$0xff]  ;;  %s1670_s19 = smov 120   ;;  %v565_v30 = vpack.c.bf16 %v561_v5, %v561_v5 }
  0x13   : > { %v563_v7 = vadd.f32 %v562_v6, %v561_v5  ;;  %v1808_v8 = vld [vmem:[%s533_s21] sm:$0xff] }
  0x14   : > { %v558_v9 = vld [vmem:[%s540_s24] sm:$0xff] }
  0x15   : > { %v564_v10 = vpack.c.bf16 %v563_v7, %v563_v7  ;;  %v559_v11 = vadd.f32 %v558_v9, %v1808_v8 }
  0x17   : > { %1518 = vmatmul.mubr.msk.bf16.vlgmr.msra.gmra.mrb[0].mxu1 %vm589_vm1, %v564_v10  ;;  %v560_v12 = vpack.c.bf16 %v559_v11, %v559_v11 }
  0x18   : > { %1531 = vmatprep.mubr.msk.bf16.mxu1 %vm1668_vm0, %v1667_v1 }
  0x19   : > { %1510 = vmatmul.mubr.msk.bf16.vlgmr.msra.gmra.mrb[0].mxu0 %vm589_vm1, %v560_v12 }
  0x1a   : > { %1525 = vmatprep.mubr.msk.bf16.mxu0 %vm1668_vm0, %v1667_v1  ;;  %1522 = vmatpush3.bf16.msra.mxu0 %v1621_v28 }
  0x1b   : > { %1523 = vmatprep.subr.bf16.mxu0 %v1667_v1 }
  0x1e   : > { %1524 = vmatpush3.bf16.msra.mxu0 %v1622_v29 }
  0x1f   : > { %1535 = vmatprep.subr.bf16.mxu0 %v1667_v1 }
  0x21   : > { %1526 = vmatmul.mubr.msk.bf16.vlgmr.msra.gmra.mrb[4].mxu0 %vm589_vm1, %v565_v30 }
  0x22   : > { %1537 = vmatprep.mubr.msk.bf16.mxu0 %vm1668_vm0, %v1667_v1 }
  0xea   : > { %v694_v14 = vpop.f32.mrb[0].mxu1 }
  0xeb   : > { %v695_v16 = vadd.f32 %v1453_v13, %v694_v14  ;;  %v1519_v17 = vpop.f32.mrb[1].mxu1 }
  0xec   : > { %v697_v18 = vpop.f32.mrb[2].mxu1  ;;  %v627_v19 = vpop.f32.mrb[0].mxu0 }
  0xed   : > { %v700_v20 = vpack.c.bf16 %v695_v16, %v695_v16  ;;  %v1520_v21 = vpop.f32.mrb[3].mxu1  ;;  %v628_v22 = vadd.f32 %v1449_v15, %v627_v19  ;;  %v1511_v23 = vpop.f32.mrb[1].mxu0 }
  0xee   : > { %v630_v24 = vpop.f32.mrb[2].mxu0 }
  0xef   : > { %v633_v25 = vpack.c.bf16 %v628_v22, %v628_v22  ;;  %989 = vrot.lane.b32.xlu1 %v700_v20, %s1669_s18  ;;  %878 = vrot.lane.b32.xlu0 %v700_v20, %s1670_s19  ;;  %v773_v26 = vsel %vm768_vm2, %v700_v20, 0  ;;  %v1512_v27 = vpop.f32.mrb[3].mxu0 }
  0xf0   : > { %1530 = vmatpush3.bf16.xpose.msra.mxu1 %v773_v26 }
  0xf1   : > { %1541 = vmatprep.subr.bf16.mxu1 %v1667_v1 }
  0xf3   : > { %987 = vrot.lane.b32.xlu1 %v633_v25, %s1669_s18  ;;  %875 = vrot.lane.b32.xlu0 %v633_v25, %s1670_s19 }
  0xf4   : > { %v761_v46 = vpop.f32.mrb[4].mxu0 }
  0xf5   : > { %v762_v47 = vadd.f32 %v1457_v45, %v761_v46  ;;  %v1527_v48 = vpop.f32.mrb[5].mxu0 }
  0xf6   : > { %v764_v49 = vpop.f32.mrb[6].mxu0 }
  0xf7   : > { %1097 = vrot.lane.b32.xlu1 %v633_v25, %s1671_s20  ;;  %1099 = vrot.lane.b32.xlu0 %v700_v20, %s1671_s20  ;;  %v767_v50 = vpack.c.bf16 %v762_v47, %v762_v47  ;;  %v1528_v51 = vpop.f32.mrb[7].mxu0 }
  0xf8   : > { %1532 = vmatmul.mubr.msk.bf16.vlgmr.msra.gmra.mrb[4].mxu1 %vm768_vm2, %v633_v25 }
  0xf9   : > { %1543 = vmatprep.mubr.msk.bf16.mxu1 %vm1668_vm0, %v1667_v1  ;;  %v832_v52 = vsel %vm830_vm3, %v767_v50, 0 }
  0xfa   : > { %1536 = vmatpush3.bf16.msra.mxu0 %v832_v52  ;;  %v1623_v52 = vld [vmem:[%s1936_s10] sm:$0xff]  }
  0xfb   : > { %1547 = vmatprep.subr.bf16.mxu0 %v1667_v1 }
 0x161   : > { %v879_v31 = vpop.permute.xlu0 %878  ;;  %v990_v33 = vpop.permute.xlu1 %989 }
 0x162   : > { %v884_v32 = vsel %vm768_vm2, %v879_v31, 0  ;;  %v995_v35 = vsel %vm768_vm2, %v990_v33, 0 }
 0x163   : > { %1542 = vmatpush3.bf16.xpose.msra.mxu1 %v884_v32 }
 0x164   : > { %1553 = vmatprep.subr.bf16.mxu1 %v1667_v1 }
 0x165   : > { %v876_v34 = vpop.permute.xlu0 %875  ;;  %v988_v37 = vpop.permute.xlu1 %987 }
 0x169   : > { %v1100_v36 = vpop.permute.xlu0 %1099  ;;  %v1098_v39 = vpop.permute.xlu1 %1097 }
 0x16a   : > { %1544 = vmatmul.mubr.msk.bf16.vlgmr.msra.gmra.mrb[8].mxu1 %vm768_vm2, %v876_v34  ;;  %v1105_v38 = vsel %vm768_vm2, %v1100_v36, 0 }
 0x16b   : > { %1554 = vmatpush3.bf16.xpose.msra.mxu1 %v995_v35  ;;  %1555 = vmatprep.mubr.msk.bf16.mxu1 %vm1668_vm0, %v1667_v1 }
 0x16c   : > { %1565 = vmatprep.subr.bf16.mxu1 %v1667_v1 }
 0x172   : > { %1556 = vmatmul.mubr.msk.bf16.vlgmr.msra.gmra.mrb[12].mxu1 %vm768_vm2, %v988_v37 }
 0x173   : > { %1566 = vmatpush3.bf16.xpose.msra.mxu1 %v1105_v38  ;;  %1567 = vmatprep.mubr.msk.bf16.mxu1 %vm1668_vm0, %v1667_v1 }
 0x174   : > { %1577 = vmatprep.subr.bf16.mxu1 %v1667_v1 }
 0x17a   : > { %1568 = vmatmul.mubr.msk.bf16.vlgmr.msra.gmra.mrb[16].mxu1 %vm768_vm2, %v1098_v39 }
 0x17b   : > { %1581 = vmatprep.mubr.msk.bf16.mxu1 %vm1668_vm0, %v1667_v1  ;;  %1578 = vmatpush3.bf16.msra.mxu1 %v1623_v52 }
 0x17c   : > { %1579 = vmatprep.subr.bf16.mxu1 %v1667_v1 }
 0x1cb   : > { %v809_v40 = vpop.f32.mrb[4].mxu1 }
 0x1cc   : > { %v1533_v41 = vpop.f32.mrb[5].mxu1  ;;  %v815_v42 = vsel %vm768_vm2, %v809_v40, -inf }
 0x1cd   : > { %816 = vmax.xlane.f32.xlu0 %v815_v42  ;;  %v812_v43 = vpop.f32.mrb[6].mxu1 }
 0x1ce   : > { %v1534_v44 = vpop.f32.mrb[7].mxu1 }
 0x23d   : > { %v920_v53 = vpop.f32.mrb[8].mxu1 }
 0x23e   : > { %v1545_v54 = vpop.f32.mrb[9].mxu1  ;;  %v926_v55 = vsel %vm768_vm2, %v920_v53, -inf }
 0x23f   : > { %927 = vmax.xlane.f32.xlu1 %v926_v55  ;;  %v923_v56 = vpop.f32.mrb[10].mxu1 }
 0x240   : > { %v1546_v57 = vpop.f32.mrb[11].mxu1 }
 0x241   : > { %v1624_v57 = vld [vmem:[%s1936_s10 + $0x8] sm:$0xff]  }
 0x242   : > { %1580 = vmatpush3.bf16.msra.mxu1 %v1624_v57 }
 0x245   : > { %v1031_v58 = vpop.f32.mrb[12].mxu1 }
 0x246   : > { %v1557_v59 = vpop.f32.mrb[13].mxu1  ;;  %v1037_v60 = vsel %vm768_vm2, %v1031_v58, -inf }
 0x247   : > { %1038 = vmax.xlane.f32.xlu0 %v1037_v60  ;;  %v1034_v61 = vpop.f32.mrb[14].mxu1 }
 0x248   : > { %v1558_v62 = vpop.f32.mrb[15].mxu1 }
 0x24d   : > { %v1141_v63 = vpop.f32.mrb[16].mxu1 }
 0x24e   : > { %v1569_v0 = vpop.f32.mrb[17].mxu1  ;;  %v1147_v2 = vsel %vm768_vm2, %v1141_v63, -inf }
 0x24f   : > { %1148 = vmax.xlane.f32.xlu0 %v1147_v2  ;;  %v1144_v3 = vpop.f32.mrb[18].mxu1 }
 0x250   : > { %v1570_v4 = vpop.f32.mrb[19].mxu1 }
 0x25a   : > { %v817_v5 = vpop.xlane.xlu0 %816 }
 0x25b   : > { %v818_v6 = vsub.f32 %v809_v40, %v817_v5 }
 0x25d   : > { %v819_v7 = vmul.f32 1.442695, %v818_v6 }
 0x25f   : > { %1625 = vpow2.f32 %v819_v7 }
 0x269   : > { %v1626_v9 = vpop.eup %1625 }
 0x26a   : > { %v821_v10 = vsel %vm768_vm2, %v1626_v9, 0.0 }
 0x26b   : > { %822 = vadd.xlane.f32.xlu1 %v821_v10  ;;  %v1469_v10 = vld [vmem:[%s1937_s11] ss:$0 sm:$0xff] }
 0x27c   : > { %939 = vrot.lane.b32.xlu1 %v767_v50, %s1670_s19 }
 0x2cc   : > { %v928_v11 = vpop.xlane.xlu1 %927 }
 0x2cd   : > { %v929_v12 = vsub.f32 %v920_v53, %v928_v11  ;;  %v1232_v11 = vadd.f32 %v1469_v10, %v1808_v8 }
 0x2cf   : > { %v930_v13 = vmul.f32 1.442695, %v929_v12 }
 0x2d1   : > { %1627 = vpow2.f32 %v930_v13 }
 0x2d4   : > { %v1039_v14 = vpop.xlane.xlu0 %1038 }
 0x2d5   : > { %v1040_v15 = vsub.f32 %v1031_v58, %v1039_v14 }
 0x2d7   : > { %v1041_v16 = vmul.f32 1.442695, %v1040_v15 }
 0x2d9   : > { %1629 = vpow2.f32 %v1041_v16 }
 0x2db   : > { %v1628_v17 = vpop.eup %1627 }
 0x2dc   : > { %v1149_v18 = vpop.xlane.xlu0 %1148  ;;  %v932_v19 = vsel %vm768_vm2, %v1628_v17, 0.0 }
 0x2dd   : > { %v1150_v20 = vsub.f32 %v1141_v63, %v1149_v18  ;;  %933 = vadd.xlane.f32.xlu0 %v932_v19 }
 0x2df   : > { %v1151_v21 = vmul.f32 1.442695, %v1150_v20 }
 0x2e1   : > { %1631 = vpow2.f32 %v1151_v21 }
 0x2e3   : > { %v1630_v22 = vpop.eup %1629 }
 0x2e4   : > { %v1043_v23 = vsel %vm768_vm2, %v1630_v22, 0.0 }
 0x2e5   : > { %1044 = vadd.xlane.f32.xlu1 %v1043_v23 }
 0x2eb   : > { %v1632_v24 = vpop.eup %1631 }
 0x2ec   : > { %v1153_v25 = vsel %vm768_vm2, %v1632_v24, 0.0 }
 0x2ed   : > { %1154 = vadd.xlane.f32.xlu0 %v1153_v25 }
 0x2f6   : > { %1159 = vrot.lane.b32.xlu1 %v767_v50, %s1671_s20  ;;  %s1673_s20 = smov 16  }
 0x2f8   : > { %v823_v26 = vpop.xlane.xlu1 %822 }
 0x2f9   : > { %1633 = vrcp.f32 %v823_v26 }
 0x2fc   : > { %v940_v28 = vpop.permute.xlu1 %939 }
 0x2fd   : > { %v945_v31 = vsel %vm830_vm3, %v940_v28, 0  ;;  %v1473_v28 = vld [vmem:[%s1938_s12] ss:$0 sm:$0xff] }
 0x303   : > { %v1634_v27 = vpop.eup %1633  ;;  %1049 = vrot.lane.b32.xlu0 %v767_v50, %s1669_s18  ;;  %s555_s18 = scalar_lea.vmem %s1940_s14, %s1788_s25 }
 0x304   : > { %v825_v29 = vmul.f32 %v1634_v27, %v1626_v9 }
 0x306   : > { %v826_v30 = vpack.c.bf16 %v825_v29, %v825_v29 }
 0x308   : > { %1538 = vmatmul.mubr.msk.bf16.vlgmr.msra.gmra.mrb[8].mxu0 %vm768_vm2, %v826_v30  ;;  %v1474_v30 = vld [vmem:[%s1939_s13] ss:$0 sm:$0xff] }
 0x309   : > { %1548 = vmatpush3.bf16.msra.mxu0 %v945_v31  ;;  %1549 = vmatprep.mubr.msk.bf16.mxu0 %vm1668_vm0, %v1667_v1 }
 0x30a   : > { %1559 = vmatprep.subr.bf16.mxu0 %v1667_v1 }
 0x36a   : > { %v934_v32 = vpop.xlane.xlu0 %933 }
 0x36b   : > { %1635 = vrcp.f32 %v934_v32 }
 0x372   : > { %v1045_v33 = vpop.xlane.xlu1 %1044 }
 0x373   : > { %1637 = vrcp.f32 %v1045_v33 }
 0x375   : > { %v1636_v34 = vpop.eup %1635 }
 0x376   : > { %v936_v35 = vmul.f32 %v1636_v34, %v1628_v17  ;;  %v1160_v42 = vpop.permute.xlu1 %1159 }
 0x377   : > { %v1165_v44 = vsel %vm830_vm3, %v1160_v42, 0 }
 0x378   : > { %v937_v36 = vpack.c.bf16 %v936_v35, %v936_v35 }
 0x37a   : > { %v1155_v37 = vpop.xlane.xlu0 %1154  ;;  %1550 = vmatmul.mubr.msk.bf16.vlgmr.msra.gmra.mrb[12].mxu0 %vm768_vm2, %v937_v36 }
 0x37b   : > { %1639 = vrcp.f32 %v1155_v37  ;;  %1561 = vmatprep.mubr.msk.bf16.mxu0 %vm1668_vm0, %v1667_v1 }
 0x37d   : > { %v1638_v38 = vpop.eup %1637 }
 0x37e   : > { %v1047_v39 = vmul.f32 %v1638_v38, %v1630_v22  ;;  %v1050_v40 = vpop.permute.xlu0 %1049 }
 0x37f   : > { %v1055_v41 = vsel %vm830_vm3, %v1050_v40, 0 }
 0x380   : > { %1560 = vmatpush3.bf16.msra.mxu0 %v1055_v41  ;;  %v1048_v43 = vpack.c.bf16 %v1047_v39, %v1047_v39 }
 0x381   : > { %1571 = vmatprep.subr.bf16.mxu0 %v1667_v1 }
 0x383   : > { %1562 = vmatmul.mubr.msk.bf16.vlgmr.msra.gmra.mrb[16].mxu0 %vm768_vm2, %v1048_v43 }
 0x384   : > { %1572 = vmatpush3.bf16.msra.mxu0 %v1165_v44  ;;  %1573 = vmatprep.mubr.msk.bf16.mxu0 %vm1668_vm0, %v1667_v1 }
 0x385   : > { %v1640_v45 = vpop.eup %1639 }
 0x386   : > { %v1157_v46 = vmul.f32 %v1640_v45, %v1632_v24 }
 0x388   : > { %v1158_v47 = vpack.c.bf16 %v1157_v46, %v1157_v46 }
 0x38b   : > { %1574 = vmatmul.mubr.msk.bf16.vlgmr.msra.gmra.mrb[20].mxu0 %vm768_vm2, %v1158_v47 }
 0x3db   : > { %v868_v48 = vpop.f32.mrb[8].mxu0 }
 0x3dc   : > { %v1539_v49 = vpop.f32.mrb[9].mxu0 }
 0x3dd   : > { %v871_v50 = vpop.f32.mrb[10].mxu0 }
 0x3de   : > { %v1540_v51 = vpop.f32.mrb[11].mxu0 }
 0x44d   : > { %v981_v53 = vpop.f32.mrb[12].mxu0 }
 0x44e   : > { %1208 = vrot.lane.b32.xlu1 %v981_v53, %s1672_s17  ;;  %v1551_v54 = vpop.f32.mrb[13].mxu0 }
 0x44f   : > { %v984_v55 = vpop.f32.mrb[14].mxu0 }
 0x450   : > { %v1552_v56 = vpop.f32.mrb[15].mxu0 }
 0x456   : > { %v1091_v58 = vpop.f32.mrb[16].mxu0 }
 0x457   : > { %1212 = vrot.lane.b32.xlu0 %v1091_v58, %s1673_s20  ;;  %v1563_v59 = vpop.f32.mrb[17].mxu0 }
 0x458   : > { %v1094_v60 = vpop.f32.mrb[18].mxu0 }
 0x459   : > { %v1564_v61 = vpop.f32.mrb[19].mxu0 }
 0x45e   : > { %v1201_v62 = vpop.f32.mrb[20].mxu0 }
 0x45f   : > { %1216 = vrot.lane.b32.xlu1 %v1201_v62, %s1674_s29  ;;  %v1575_v1 = vpop.f32.mrb[21].mxu0 }
 0x460   : > { %v1204_v63 = vpop.f32.mrb[22].mxu0 }
 0x461   : > { %v1576_v0 = vpop.f32.mrb[23].mxu0 }
 0x4c0   : > { %v1209_v2 = vpop.permute.xlu1 %1208 }
 0x4c1   : > { %v1219_v4 = vsel %vm768_vm2, %v868_v48, %v1209_v2 }
 0x4c9   : > { %v1213_v3 = vpop.permute.xlu0 %1212 }
 0x4ca   : > { %v1221_v5 = vsel %vm1220_vm4, %v1219_v4, %v1213_v3 }
 0x4d1   : > { %v1217_v6 = vpop.permute.xlu1 %1216 }
 0x4d2   : > { %v1223_v7 = vsel %vm1222_vm5, %v1221_v5, %v1217_v6 }
 0x4d3   : > { %v1224_v9 = vpack.c.bf16 %v1223_v7, %v1223_v7 }
 0x4d5   : > { %1582 = vmatmul.mubr.msk.bf16.vlgmr.msra.gmra.mrb[20].mxu1 %vm589_vm1, %v1224_v9 }
 0x5a8   : > { %v1286_v12 = vpop.f32.mrb[20].mxu1 }
 0x5a9   : > { %v1292_v13 = vadd.f32 %v1286_v12, %v1232_v11  ;;  %v1583_v14 = vpop.f32.mrb[21].mxu1 }
 0x5aa   : > { %v1289_v15 = vpop.f32.mrb[22].mxu1 }
 0x5ab   : > { %v1584_v16 = vpop.f32.mrb[23].mxu1  ;;  %v1295_v17 = vsel %vm589_vm1, %v1292_v13, 0.0  ;;  %v1300_v18 = vmul.f32 %v1292_v13, %v1292_v13 }
 0x5ac   : > { %1296 = vadd.xlane.f32.xlu0 %v1295_v17 }
 0x5ad   : > { %v1301_v19 = vsel %vm589_vm1, %v1300_v18, 0.0 }
 0x5ae   : > { %1302 = vadd.xlane.f32.xlu1 %v1301_v19 }
 0x639   : > { %v1297_v20 = vpop.xlane.xlu0 %1296 }
 0x63a   : > { %v1299_v21 = vmul.f32 0.03125, %v1297_v20 }
 0x63b   : > { %v1303_v22 = vpop.xlane.xlu1 %1302 }
 0x63c   : > { %v1305_v23 = vmul.f32 %v1299_v21, %v1299_v21  ;;  %v1304_v24 = vmul.f32 0.03125, %v1303_v22  ;;  %v1307_v26 = vsub.f32 %v1292_v13, %v1299_v21 }
 0x63e   : > { %v1306_v25 = vsub.f32 %v1304_v24, %v1305_v23 }
 0x640   : > { %v1308_v8 = vadd.f32 1e-05, %v1306_v25 }
 0x642   : > { %1641 = vrsqrt.f32 %v1308_v8 }
 0x64c   : > { %v1642_v27 = vpop.eup %1641 }
 0x64d   : > { %v1310_v29 = vmul.f32 %v1642_v27, %v1307_v26 }
 0x64f   : > { %v1317_v31 = vmul.f32 %v1473_v28, %v1310_v29 }
 0x651   : > { %v1324_v32 = vadd.f32 %v1474_v30, %v1317_v31 }
 0x653   : > { %1325 = vst.msk [vmem:[%s555_s18] sm:$0xff] %vm589_vm1, %v1324_v32 }
 0x654 PF: > { %s24_s15 = sadd.s32 1, %s1665_s15   ;;  %s1941_s29 = smov %s1661_s30 }
 0x655   : > { %p21_p5 = scmp.ge.s32.totalorder %s24_s15, 4   ;;  %s1942_s30 = smov %s1944_s16 }
 0x657   :  { %23 = sbr.rel (!%p21_p5) target bundleno = 2 (0x2), region = 115 }

</bundles_post_ra>
